<compile_context>
chip_gen: v7x
topology: tpu7x:2x2x1
jax: 0.10.0
libtpu: 0.0.40
codegen_flags: <defaults>
</compile_context>

<pallas_src>
import jax
import jax.numpy as jnp
import numpy as np
from jax.experimental import pallas as pl
from jax.experimental.pallas import tpu as pltpu


# ----------------------- fused embed + LSTM + head kernel -------------------
def _fused_lstm_head_kernel(tok_ref, emb_ref, h0_ref, c0_ref,
                            wih_ref, whh_ref, b_ref,
                            w1_ref, b1_ref, w2_ref, b2_ref,
                            out_ref, hT_ref, cT_ref,
                            xwi_scr, xwf_scr, xwg_scr, xwo_scr, y_scr):
    Bp, H = h0_ref.shape            # padded batch (8), hidden
    TBp = tok_ref.shape[0]          # T * Bp
    T = TBp // Bp
    V = emb_ref.shape[0]

    # (0) Embedding gather as a one-hot matmul (no dynamic indexing, no XLA
    #     gather).  Padded rows carry token id -1 -> all-zero one-hot -> zero
    #     embedding row; those rows are discarded by the wrapper.
    lane_id = jax.lax.broadcasted_iota(jnp.int32, (TBp, V), 1)
    onehot = jnp.where(tok_ref[...] == lane_id, 1.0, 0.0)            # (TBp, V)
    x = jnp.dot(onehot, emb_ref[...],
                preferred_element_type=jnp.float32)                  # (TBp, E)

    # (1) Hoisted, gate-major input projections (bias folded in).  Each gate
    #     slab lives at lanes 0..H-1 -> no per-step 32-lane extractions.
    xwi_scr[...] = jnp.dot(x, wih_ref[0], preferred_element_type=jnp.float32) + b_ref[0]
    xwf_scr[...] = jnp.dot(x, wih_ref[1], preferred_element_type=jnp.float32) + b_ref[1]
    xwg_scr[...] = jnp.dot(x, wih_ref[2], preferred_element_type=jnp.float32) + b_ref[2]
    xwo_scr[...] = jnp.dot(x, wih_ref[3], preferred_element_type=jnp.float32) + b_ref[3]

    # Recurrent weights loaded once, gate-major (each (H, H)).
    whh_i = whh_ref[0]
    whh_f = whh_ref[1]
    whh_g = whh_ref[2]
    whh_o = whh_ref[3]

    # (2) Time recurrence, fully unrolled in-kernel.  Only h @ W_hh_k sits on
    #     the serial per-step critical path; all VMEM traffic is whole-tile
    #     aligned ((Bp, H) = (8, 32) at 8-aligned sublane offsets).
    def step(t, carry):
        h, c = carry
        r = pl.multiple_of(t * Bp, Bp)      # aligned whole-tile window
        gi = xwi_scr[pl.ds(r, Bp), :] + jnp.dot(h, whh_i, preferred_element_type=jnp.float32)
        gf = xwf_scr[pl.ds(r, Bp), :] + jnp.dot(h, whh_f, preferred_element_type=jnp.float32)
        gg = xwg_scr[pl.ds(r, Bp), :] + jnp.dot(h, whh_g, preferred_element_type=jnp.float32)
        go = xwo_scr[pl.ds(r, Bp), :] + jnp.dot(h, whh_o, preferred_element_type=jnp.float32)
        # PyTorch gate order [i, f, g, o].
        i_g = jax.nn.sigmoid(gi)
        f_g = jax.nn.sigmoid(gf)
        g_g = jnp.tanh(gg)
        o_g = jax.nn.sigmoid(go)
        c_new = f_g * c + i_g * g_g
        h_new = o_g * jnp.tanh(c_new)
        y_scr[pl.ds(r, Bp), :] = h_new      # stays in VMEM; no per-step HBM I/O
        return h_new, c_new

    h_last, c_last = jax.lax.fori_loop(
        0, T, step, (h0_ref[...], c0_ref[...]), unroll=True)

    # (3) Final state written once.
    hT_ref[...] = h_last
    cT_ref[...] = c_last

    # (4) Fused head: Tanh -> Linear -> Tanh -> Linear on the VMEM-resident Y
    #     slab; only the (T*Bp, C) logits go back to HBM.
    z = jnp.tanh(y_scr[...])
    z = jnp.tanh(jnp.dot(z, w1_ref[...], preferred_element_type=jnp.float32)
                 + b1_ref[...])
    out_ref[...] = (jnp.dot(z, w2_ref[...], preferred_element_type=jnp.float32)
                    + b2_ref[...])


def fused_lstm_head(tok_p, emb, h0, c0, wih_g4, whh_g4, b_g4, w1_t, b1, w2_t, b2):
    """tok_p: (T*Bp, 1) int32 (padded rows = -1); emb: (V, E);
    h0/c0: (Bp, H); wih_g4: (4, E, H); whh_g4: (4, H, H); b_g4: (4, 1, H);
    w1_t: (H, H); b1: (1, H); w2_t: (H, C); b2: (1, C)."""
    TBp = tok_p.shape[0]
    V, E = emb.shape
    Bp, H = h0.shape
    C = w2_t.shape[-1]

    def full(shape):
        n = len(shape)
        return pl.BlockSpec(shape, lambda i, _n=n: (0,) * _n)

    return pl.pallas_call(
        _fused_lstm_head_kernel,
        out_shape=(jax.ShapeDtypeStruct((TBp, C), jnp.float32),
                   jax.ShapeDtypeStruct((Bp, H), jnp.float32),
                   jax.ShapeDtypeStruct((Bp, H), jnp.float32)),
        grid_spec=pltpu.PrefetchScalarGridSpec(
            num_scalar_prefetch=0,
            grid=(1,),                       # single invocation; loop in-kernel
            in_specs=[full((TBp, 1)), full((V, E)),
                      full((Bp, H)), full((Bp, H)),
                      full((4, E, H)), full((4, H, H)), full((4, 1, H)),
                      full((H, H)), full((1, H)), full((H, C)), full((1, C))],
            out_specs=[full((TBp, C)), full((Bp, H)), full((Bp, H))],
            scratch_shapes=[pltpu.VMEM((TBp, H), jnp.float32),   # xw_i
                            pltpu.VMEM((TBp, H), jnp.float32),   # xw_f
                            pltpu.VMEM((TBp, H), jnp.float32),   # xw_g
                            pltpu.VMEM((TBp, H), jnp.float32),   # xw_o
                            pltpu.VMEM((TBp, H), jnp.float32)]), # y
        compiler_params=pltpu.CompilerParams(
            dimension_semantics=("arbitrary",)),
    )(tok_p, emb, h0, c0, wih_g4, whh_g4, b_g4, w1_t, b1, w2_t, b2)


# ------------------------------ full model ----------------------------------
def prepare_params(raw):
    """One-time prep: gate-major splits / transposes / bias fusion hoisted out
    of the forward path (PyTorch gate order [i, f, g, o])."""
    H = raw["whh"].shape[1]
    E = raw["wih"].shape[1]
    b = raw["bih"] + raw["bhh"]
    return {
        "embedding": raw["embedding"],
        "wih_g4": jnp.transpose(raw["wih"].reshape(4, H, E), (0, 2, 1)),  # (4,E,H)
        "whh_g4": jnp.transpose(raw["whh"].reshape(4, H, H), (0, 2, 1)),  # (4,H,H)
        "b_g4": b.reshape(4, 1, H),                                       # (4,1,H)
        "w1_t": raw["w1"].T, "b1": raw["b1"][None, :],  # (H, H), (1, H)
        "w2_t": raw["w2"].T, "b2": raw["b2"][None, :],  # (H, C), (1, C)
    }


@jax.jit
def rnn_model_forward(tokens, state, p):
    """Mirrors RNNModel.forward: returns (output, (h_n, c_n))."""
    T, B = tokens.shape
    H = p["w1_t"].shape[0]
    C = p["w2_t"].shape[-1]
    h0, c0 = state                                       # each (1, B, H)

    # Pad batch to one full sublane group (multiple of 8); LSTM rows are
    # independent so padded rows are harmless and sliced away afterwards.
    Bp = max(8, -(-B // 8) * 8)
    tok_p = jnp.full((T, Bp), -1, jnp.int32).at[:, :B].set(tokens.astype(jnp.int32))
    tok_p = tok_p.reshape(T * Bp, 1)
    h0p = jnp.zeros((Bp, H), jnp.float32).at[:B, :].set(h0[0])
    c0p = jnp.zeros((Bp, H), jnp.float32).at[:B, :].set(c0[0])

    out_p, hT_p, cT_p = fused_lstm_head(
        tok_p, p["embedding"], h0p, c0p,
        p["wih_g4"], p["whh_g4"], p["b_g4"],
        p["w1_t"], p["b1"], p["w2_t"], p["b2"])

    out = out_p.reshape(T, Bp, C)[:, :B, :].reshape(T * B, C)
    return out, (hT_p[:B][None], cT_p[:B][None])


# ----------------------- pure-JAX reference (sanity) ------------------------
def _reference_forward(tokens, state, raw):
    prec = jax.lax.Precision.HIGHEST
    x = jnp.take(raw["embedding"], tokens, axis=0)       # (T, B, E)
    T, B, _ = x.shape
    H = raw["whh"].shape[1]
    h, c = state[0][0], state[1][0]
    b = raw["bih"] + raw["bhh"]
    ys = []
    for t in range(T):
        gates = (jnp.dot(x[t], raw["wih"].T, precision=prec)
                 + jnp.dot(h, raw["whh"].T, precision=prec) + b)
        i_g = jax.nn.sigmoid(gates[:, 0 * H:1 * H])
        f_g = jax.nn.sigmoid(gates[:, 1 * H:2 * H])
        g_g = jnp.tanh(gates[:, 2 * H:3 * H])
        o_g = jax.nn.sigmoid(gates[:, 3 * H:4 * H])
        c = f_g * c + i_g * g_g
        h = o_g * jnp.tanh(c)
        ys.append(h)
    y = jnp.stack(ys).reshape(T * B, H)
    z = jnp.tanh(y)
    z = jnp.tanh(jnp.dot(z, raw["w1"].T, precision=prec) + raw["b1"])
    out = jnp.dot(z, raw["w2"].T, precision=prec) + raw["b2"]
    return out, (h[None], c[None])


if __name__ == "__main__":
    # Small, module-consistent shapes.
    T, B, E, H, C, V = 8, 2, 16, 32, 8, 20   # seq, batch, embed, hidden, categories, vocab

    key = jax.random.PRNGKey(0)
    ks = jax.random.split(key, 12)
    s = 1.0 / (H ** 0.5)   # PyTorch LSTM / Linear default init scale

    raw_params = {
        "embedding": jax.random.normal(ks[0], (V, E), jnp.float32),
        "wih": jax.random.uniform(ks[2], (4 * H, E), jnp.float32, -s, s),
        "whh": jax.random.uniform(ks[3], (4 * H, H), jnp.float32, -s, s),
        "bih": jax.random.uniform(ks[4], (4 * H,), jnp.float32, -s, s),
        "bhh": jax.random.uniform(ks[5], (4 * H,), jnp.float32, -s, s),
        "w1":  jax.random.uniform(ks[6], (H, H), jnp.float32, -s, s),
        "b1":  jax.random.uniform(ks[7], (H,), jnp.float32, -s, s),
        "w2":  jax.random.uniform(ks[8], (C, H), jnp.float32, -s, s),
        "b2":  jax.random.uniform(ks[9], (C,), jnp.float32, -s, s),
    }
    params = prepare_params(raw_params)                  # hoisted, done once

    tokens = jax.random.randint(ks[1], (T, B), 0, V)     # integer token ids
    state0 = (jnp.zeros((1, B, H), jnp.float32),
              jnp.zeros((1, B, H), jnp.float32))

    output, state = rnn_model_forward(tokens, state0, params)
    jax.block_until_ready(output)
    jax.block_until_ready(state[0])
    jax.block_until_ready(state[1])

    assert output.shape == (T * B, C)
    assert state[0].shape == (1, B, H) and state[1].shape == (1, B, H)

    # Structural sanity check against a pure-JAX reference (loose tolerance to
    # absorb MXU vs XLA matmul / EUP transcendental differences).
    ref_out, (ref_h, ref_c) = _reference_forward(tokens, state0, raw_params)
    np.testing.assert_allclose(np.asarray(output), np.asarray(ref_out),
                               rtol=2e-2, atol=2e-2)
    np.testing.assert_allclose(np.asarray(state[0]), np.asarray(ref_h),
                               rtol=2e-2, atol=2e-2)
    np.testing.assert_allclose(np.asarray(state[1]), np.asarray(ref_c),
                               rtol=2e-2, atol=2e-2)

    print("KERNEL_OK")
</pallas_src>

<mosaic_0001>
module attributes {stable_mosaic.version = 11 : i64} {
  func.func @_fused_lstm_head_kernel(%arg0: i32, %arg1: memref<64x1xi32, #tpu.memory_space<vmem>>, %arg2: memref<20x16xf32, #tpu.memory_space<vmem>>, %arg3: memref<8x32xf32, #tpu.memory_space<vmem>>, %arg4: memref<8x32xf32, #tpu.memory_space<vmem>>, %arg5: memref<4x16x32xf32, #tpu.memory_space<vmem>>, %arg6: memref<4x32x32xf32, #tpu.memory_space<vmem>>, %arg7: memref<4x1x32xf32, #tpu.memory_space<vmem>>, %arg8: memref<32x32xf32, #tpu.memory_space<vmem>>, %arg9: memref<1x32xf32, #tpu.memory_space<vmem>>, %arg10: memref<32x8xf32, #tpu.memory_space<vmem>>, %arg11: memref<1x8xf32, #tpu.memory_space<vmem>>, %arg12: memref<64x8xf32, #tpu.memory_space<vmem>>, %arg13: memref<8x32xf32, #tpu.memory_space<vmem>>, %arg14: memref<8x32xf32, #tpu.memory_space<vmem>>, %arg15: memref<64x32xf32, #tpu.memory_space<vmem>>, %arg16: memref<64x32xf32, #tpu.memory_space<vmem>>, %arg17: memref<64x32xf32, #tpu.memory_space<vmem>>, %arg18: memref<64x32xf32, #tpu.memory_space<vmem>>, %arg19: memref<64x32xf32, #tpu.memory_space<vmem>>) attributes {dimension_semantics = [#tpu.dimension_semantics<arbitrary>], iteration_bounds = array<i64: 1>, scalar_prefetch = 0 : i64, scratch_operands = 5 : i64, tpu.core_type = #tpu.core_type<tc>, window_params = [{pipeline_mode = #tpu.pipeline_mode<synchronous>, transform_indices = @transform_0, window_bounds = array<i64: 64, 1>}, {pipeline_mode = #tpu.pipeline_mode<synchronous>, transform_indices = @transform_1, window_bounds = array<i64: 20, 16>}, {pipeline_mode = #tpu.pipeline_mode<synchronous>, transform_indices = @transform_2, window_bounds = array<i64: 8, 32>}, {pipeline_mode = #tpu.pipeline_mode<synchronous>, transform_indices = @transform_3, window_bounds = array<i64: 8, 32>}, {pipeline_mode = #tpu.pipeline_mode<synchronous>, transform_indices = @transform_4, window_bounds = array<i64: 4, 16, 32>}, {pipeline_mode = #tpu.pipeline_mode<synchronous>, transform_indices = @transform_5, window_bounds = array<i64: 4, 32, 32>}, {pipeline_mode = #tpu.pipeline_mode<synchronous>, transform_indices = @transform_6, window_bounds = array<i64: 4, 1, 32>}, {pipeline_mode = #tpu.pipeline_mode<synchronous>, transform_indices = @transform_7, window_bounds = array<i64: 32, 32>}, {pipeline_mode = #tpu.pipeline_mode<synchronous>, transform_indices = @transform_8, window_bounds = array<i64: 1, 32>}, {pipeline_mode = #tpu.pipeline_mode<synchronous>, transform_indices = @transform_9, window_bounds = array<i64: 32, 8>}, {pipeline_mode = #tpu.pipeline_mode<synchronous>, transform_indices = @transform_10, window_bounds = array<i64: 1, 8>}, {pipeline_mode = #tpu.pipeline_mode<synchronous>, transform_indices = @transform_11, window_bounds = array<i64: 64, 8>}, {pipeline_mode = #tpu.pipeline_mode<synchronous>, transform_indices = @transform_12, window_bounds = array<i64: 8, 32>}, {pipeline_mode = #tpu.pipeline_mode<synchronous>, transform_indices = @transform_13, window_bounds = array<i64: 8, 32>}]} {
    %0 = tpu.iota {dimensions = array<i32: 1>} : vector<64x20xi32>
    %c0 = arith.constant 0 : index
    %c0_0 = arith.constant 0 : index
    %1 = vector.load %arg1[%c0, %c0_0] : memref<64x1xi32, #tpu.memory_space<vmem>>, vector<64x1xi32>
    %2 = vector.broadcast %1 : vector<64x1xi32> to vector<64x20xi32>
    %3 = arith.cmpi eq, %2, %0 : vector<64x20xi32>
    %cst = arith.constant 1.000000e+00 : f32
    %cst_1 = arith.constant 0.000000e+00 : f32
    %4 = vector.broadcast %cst : f32 to vector<64x20xf32>
    %5 = vector.broadcast %cst_1 : f32 to vector<64x20xf32>
    %6 = arith.select %3, %4, %5 : vector<64x20xi1>, vector<64x20xf32>
    %c0_2 = arith.constant 0 : index
    %c0_3 = arith.constant 0 : index
    %7 = vector.load %arg2[%c0_2, %c0_3] : memref<20x16xf32, #tpu.memory_space<vmem>>, vector<20x16xf32>
    %cst_4 = arith.constant dense<0.000000e+00> : vector<64x16xf32>
    %8 = tpu.matmul %6, %7, %cst_4 {dimension_numbers = #tpu.dot_dimension_numbers<[1], [0], [0], [1], [0, 0, 1, 1], [], []>} : vector<64x20xf32>, vector<20x16xf32>, vector<64x16xf32> -> vector<64x16xf32>
    %c0_5 = arith.constant 0 : index
    %c0_6 = arith.constant 0 : index
    %c0_7 = arith.constant 0 : index
    %9 = vector.load %arg5[%c0_5, %c0_6, %c0_7] : memref<4x16x32xf32, #tpu.memory_space<vmem>>, vector<1x16x32xf32>
    %10 = vector.shape_cast %9 : vector<1x16x32xf32> to vector<16x32xf32>
    %cst_8 = arith.constant dense<0.000000e+00> : vector<64x32xf32>
    %11 = tpu.matmul %8, %10, %cst_8 {dimension_numbers = #tpu.dot_dimension_numbers<[1], [0], [0], [1], [0, 0, 1, 1], [], []>} : vector<64x16xf32>, vector<16x32xf32>, vector<64x32xf32> -> vector<64x32xf32>
    %c0_9 = arith.constant 0 : index
    %c0_10 = arith.constant 0 : index
    %c0_11 = arith.constant 0 : index
    %12 = vector.load %arg7[%c0_9, %c0_10, %c0_11] : memref<4x1x32xf32, #tpu.memory_space<vmem>>, vector<1x1x32xf32>
    %13 = vector.shape_cast %12 : vector<1x1x32xf32> to vector<1x32xf32>
    %14 = vector.broadcast %13 : vector<1x32xf32> to vector<64x32xf32>
    %15 = arith.addf %11, %14 : vector<64x32xf32>
    %c0_12 = arith.constant 0 : index
    %c0_13 = arith.constant 0 : index
    %16 = vector.load %arg15[%c0_12, %c0_13] : memref<64x32xf32, #tpu.memory_space<vmem>>, vector<64x32xf32>
    tpu.vector_store %arg15[%c0_12, %c0_13], %15 {strides = array<i32>} : memref<64x32xf32, #tpu.memory_space<vmem>>, vector<64x32xf32>,
    %c1 = arith.constant 1 : index
    %c0_14 = arith.constant 0 : index
    %c0_15 = arith.constant 0 : index
    %17 = vector.load %arg5[%c1, %c0_14, %c0_15] : memref<4x16x32xf32, #tpu.memory_space<vmem>>, vector<1x16x32xf32>
    %18 = vector.shape_cast %17 : vector<1x16x32xf32> to vector<16x32xf32>
    %cst_16 = arith.constant dense<0.000000e+00> : vector<64x32xf32>
    %19 = tpu.matmul %8, %18, %cst_16 {dimension_numbers = #tpu.dot_dimension_numbers<[1], [0], [0], [1], [0, 0, 1, 1], [], []>} : vector<64x16xf32>, vector<16x32xf32>, vector<64x32xf32> -> vector<64x32xf32>
    %c1_17 = arith.constant 1 : index
    %c0_18 = arith.constant 0 : index
    %c0_19 = arith.constant 0 : index
    %20 = vector.load %arg7[%c1_17, %c0_18, %c0_19] : memref<4x1x32xf32, #tpu.memory_space<vmem>>, vector<1x1x32xf32>
    %21 = vector.shape_cast %20 : vector<1x1x32xf32> to vector<1x32xf32>
    %22 = vector.broadcast %21 : vector<1x32xf32> to vector<64x32xf32>
    %23 = arith.addf %19, %22 : vector<64x32xf32>
    %c0_20 = arith.constant 0 : index
    %c0_21 = arith.constant 0 : index
    %24 = vector.load %arg16[%c0_20, %c0_21] : memref<64x32xf32, #tpu.memory_space<vmem>>, vector<64x32xf32>
    tpu.vector_store %arg16[%c0_20, %c0_21], %23 {strides = array<i32>} : memref<64x32xf32, #tpu.memory_space<vmem>>, vector<64x32xf32>,
    %c2 = arith.constant 2 : index
    %c0_22 = arith.constant 0 : index
    %c0_23 = arith.constant 0 : index
    %25 = vector.load %arg5[%c2, %c0_22, %c0_23] : memref<4x16x32xf32, #tpu.memory_space<vmem>>, vector<1x16x32xf32>
    %26 = vector.shape_cast %25 : vector<1x16x32xf32> to vector<16x32xf32>
    %cst_24 = arith.constant dense<0.000000e+00> : vector<64x32xf32>
    %27 = tpu.matmul %8, %26, %cst_24 {dimension_numbers = #tpu.dot_dimension_numbers<[1], [0], [0], [1], [0, 0, 1, 1], [], []>} : vector<64x16xf32>, vector<16x32xf32>, vector<64x32xf32> -> vector<64x32xf32>
    %c2_25 = arith.constant 2 : index
    %c0_26 = arith.constant 0 : index
    %c0_27 = arith.constant 0 : index
    %28 = vector.load %arg7[%c2_25, %c0_26, %c0_27] : memref<4x1x32xf32, #tpu.memory_space<vmem>>, vector<1x1x32xf32>
    %29 = vector.shape_cast %28 : vector<1x1x32xf32> to vector<1x32xf32>
    %30 = vector.broadcast %29 : vector<1x32xf32> to vector<64x32xf32>
    %31 = arith.addf %27, %30 : vector<64x32xf32>
    %c0_28 = arith.constant 0 : index
    %c0_29 = arith.constant 0 : index
    %32 = vector.load %arg17[%c0_28, %c0_29] : memref<64x32xf32, #tpu.memory_space<vmem>>, vector<64x32xf32>
    tpu.vector_store %arg17[%c0_28, %c0_29], %31 {strides = array<i32>} : memref<64x32xf32, #tpu.memory_space<vmem>>, vector<64x32xf32>,
    %c3 = arith.constant 3 : index
    %c0_30 = arith.constant 0 : index
    %c0_31 = arith.constant 0 : index
    %33 = vector.load %arg5[%c3, %c0_30, %c0_31] : memref<4x16x32xf32, #tpu.memory_space<vmem>>, vector<1x16x32xf32>
    %34 = vector.shape_cast %33 : vector<1x16x32xf32> to vector<16x32xf32>
    %cst_32 = arith.constant dense<0.000000e+00> : vector<64x32xf32>
    %35 = tpu.matmul %8, %34, %cst_32 {dimension_numbers = #tpu.dot_dimension_numbers<[1], [0], [0], [1], [0, 0, 1, 1], [], []>} : vector<64x16xf32>, vector<16x32xf32>, vector<64x32xf32> -> vector<64x32xf32>
    %c3_33 = arith.constant 3 : index
    %c0_34 = arith.constant 0 : index
    %c0_35 = arith.constant 0 : index
    %36 = vector.load %arg7[%c3_33, %c0_34, %c0_35] : memref<4x1x32xf32, #tpu.memory_space<vmem>>, vector<1x1x32xf32>
    %37 = vector.shape_cast %36 : vector<1x1x32xf32> to vector<1x32xf32>
    %38 = vector.broadcast %37 : vector<1x32xf32> to vector<64x32xf32>
    %39 = arith.addf %35, %38 : vector<64x32xf32>
    %c0_36 = arith.constant 0 : index
    %c0_37 = arith.constant 0 : index
    %40 = vector.load %arg18[%c0_36, %c0_37] : memref<64x32xf32, #tpu.memory_space<vmem>>, vector<64x32xf32>
    tpu.vector_store %arg18[%c0_36, %c0_37], %39 {strides = array<i32>} : memref<64x32xf32, #tpu.memory_space<vmem>>, vector<64x32xf32>,
    %c0_38 = arith.constant 0 : index
    %c0_39 = arith.constant 0 : index
    %c0_40 = arith.constant 0 : index
    %41 = vector.load %arg6[%c0_38, %c0_39, %c0_40] : memref<4x32x32xf32, #tpu.memory_space<vmem>>, vector<1x32x32xf32>
    %42 = vector.shape_cast %41 : vector<1x32x32xf32> to vector<32x32xf32>
    %c1_41 = arith.constant 1 : index
    %c0_42 = arith.constant 0 : index
    %c0_43 = arith.constant 0 : index
    %43 = vector.load %arg6[%c1_41, %c0_42, %c0_43] : memref<4x32x32xf32, #tpu.memory_space<vmem>>, vector<1x32x32xf32>
    %44 = vector.shape_cast %43 : vector<1x32x32xf32> to vector<32x32xf32>
    %c2_44 = arith.constant 2 : index
    %c0_45 = arith.constant 0 : index
    %c0_46 = arith.constant 0 : index
    %45 = vector.load %arg6[%c2_44, %c0_45, %c0_46] : memref<4x32x32xf32, #tpu.memory_space<vmem>>, vector<1x32x32xf32>
    %46 = vector.shape_cast %45 : vector<1x32x32xf32> to vector<32x32xf32>
    %c3_47 = arith.constant 3 : index
    %c0_48 = arith.constant 0 : index
    %c0_49 = arith.constant 0 : index
    %47 = vector.load %arg6[%c3_47, %c0_48, %c0_49] : memref<4x32x32xf32, #tpu.memory_space<vmem>>, vector<1x32x32xf32>
    %48 = vector.shape_cast %47 : vector<1x32x32xf32> to vector<32x32xf32>
    %c0_50 = arith.constant 0 : index
    %c0_51 = arith.constant 0 : index
    %49 = vector.load %arg3[%c0_50, %c0_51] : memref<8x32xf32, #tpu.memory_space<vmem>>, vector<8x32xf32>
    %c0_52 = arith.constant 0 : index
    %c0_53 = arith.constant 0 : index
    %50 = vector.load %arg4[%c0_52, %c0_53] : memref<8x32xf32, #tpu.memory_space<vmem>>, vector<8x32xf32>
    %c0_i32 = arith.constant 0 : i32
    %c8_i32 = arith.constant 8 : i32
    %51 = arith.muli %c0_i32, %c8_i32 : i32
    %52 = tpu.assume_multiple %51, 8 : i32
    %53 = arith.index_cast %52 : i32 to index
    %c0_54 = arith.constant 0 : index
    %54 = vector.load %arg15[%53, %c0_54] : memref<64x32xf32, #tpu.memory_space<vmem>>, vector<8x32xf32>
    %cst_55 = arith.constant dense<0.000000e+00> : vector<8x32xf32>
    %55 = tpu.matmul %49, %42, %cst_55 {dimension_numbers = #tpu.dot_dimension_numbers<[1], [0], [0], [1], [0, 0, 1, 1], [], []>} : vector<8x32xf32>, vector<32x32xf32>, vector<8x32xf32> -> vector<8x32xf32>
    %56 = arith.addf %54, %55 : vector<8x32xf32>
    %57 = arith.index_cast %52 : i32 to index
    %c0_56 = arith.constant 0 : index
    %58 = vector.load %arg16[%57, %c0_56] : memref<64x32xf32, #tpu.memory_space<vmem>>, vector<8x32xf32>
    %cst_57 = arith.constant dense<0.000000e+00> : vector<8x32xf32>
    %59 = tpu.matmul %49, %44, %cst_57 {dimension_numbers = #tpu.dot_dimension_numbers<[1], [0], [0], [1], [0, 0, 1, 1], [], []>} : vector<8x32xf32>, vector<32x32xf32>, vector<8x32xf32> -> vector<8x32xf32>
    %60 = arith.addf %58, %59 : vector<8x32xf32>
    %61 = arith.index_cast %52 : i32 to index
    %c0_58 = arith.constant 0 : index
    %62 = vector.load %arg17[%61, %c0_58] : memref<64x32xf32, #tpu.memory_space<vmem>>, vector<8x32xf32>
    %cst_59 = arith.constant dense<0.000000e+00> : vector<8x32xf32>
    %63 = tpu.matmul %49, %46, %cst_59 {dimension_numbers = #tpu.dot_dimension_numbers<[1], [0], [0], [1], [0, 0, 1, 1], [], []>} : vector<8x32xf32>, vector<32x32xf32>, vector<8x32xf32> -> vector<8x32xf32>
    %64 = arith.addf %62, %63 : vector<8x32xf32>
    %65 = arith.index_cast %52 : i32 to index
    %c0_60 = arith.constant 0 : index
    %66 = vector.load %arg18[%65, %c0_60] : memref<64x32xf32, #tpu.memory_space<vmem>>, vector<8x32xf32>
    %cst_61 = arith.constant dense<0.000000e+00> : vector<8x32xf32>
    %67 = tpu.matmul %49, %48, %cst_61 {dimension_numbers = #tpu.dot_dimension_numbers<[1], [0], [0], [1], [0, 0, 1, 1], [], []>} : vector<8x32xf32>, vector<32x32xf32>, vector<8x32xf32> -> vector<8x32xf32>
    %68 = arith.addf %66, %67 : vector<8x32xf32>
    %69 = arith.negf %56 : vector<8x32xf32>
    %70 = math.exp %69 : vector<8x32xf32>
    %cst_62 = arith.constant 1.000000e+00 : f32
    %71 = vector.broadcast %cst_62 : f32 to vector<8x32xf32>
    %72 = arith.addf %71, %70 : vector<8x32xf32>
    %73 = arith.divf %71, %72 : vector<8x32xf32>
    %74 = arith.negf %60 : vector<8x32xf32>
    %75 = math.exp %74 : vector<8x32xf32>
    %cst_63 = arith.constant 1.000000e+00 : f32
    %76 = vector.broadcast %cst_63 : f32 to vector<8x32xf32>
    %77 = arith.addf %76, %75 : vector<8x32xf32>
    %78 = arith.divf %76, %77 : vector<8x32xf32>
    %79 = math.tanh %64 : vector<8x32xf32>
    %80 = arith.negf %68 : vector<8x32xf32>
    %81 = math.exp %80 : vector<8x32xf32>
    %cst_64 = arith.constant 1.000000e+00 : f32
    %82 = vector.broadcast %cst_64 : f32 to vector<8x32xf32>
    %83 = arith.addf %82, %81 : vector<8x32xf32>
    %84 = arith.divf %82, %83 : vector<8x32xf32>
    %85 = arith.mulf %78, %50 : vector<8x32xf32>
    %86 = arith.mulf %73, %79 : vector<8x32xf32>
    %87 = arith.addf %85, %86 : vector<8x32xf32>
    %88 = math.tanh %87 : vector<8x32xf32>
    %89 = arith.mulf %84, %88 : vector<8x32xf32>
    %90 = arith.index_cast %52 : i32 to index
    %c0_65 = arith.constant 0 : index
    %91 = vector.load %arg19[%90, %c0_65] : memref<64x32xf32, #tpu.memory_space<vmem>>, vector<8x32xf32>
    tpu.vector_store %arg19[%90, %c0_65], %89 {strides = array<i32>} : memref<64x32xf32, #tpu.memory_space<vmem>>, vector<8x32xf32>,
    %c1_i32 = arith.constant 1 : i32
    %c8_i32_66 = arith.constant 8 : i32
    %92 = arith.muli %c1_i32, %c8_i32_66 : i32
    %93 = tpu.assume_multiple %92, 8 : i32
    %94 = arith.index_cast %93 : i32 to index
    %c0_67 = arith.constant 0 : index
    %95 = vector.load %arg15[%94, %c0_67] : memref<64x32xf32, #tpu.memory_space<vmem>>, vector<8x32xf32>
    %cst_68 = arith.constant dense<0.000000e+00> : vector<8x32xf32>
    %96 = tpu.matmul %89, %42, %cst_68 {dimension_numbers = #tpu.dot_dimension_numbers<[1], [0], [0], [1], [0, 0, 1, 1], [], []>} : vector<8x32xf32>, vector<32x32xf32>, vector<8x32xf32> -> vector<8x32xf32>
    %97 = arith.addf %95, %96 : vector<8x32xf32>
    %98 = arith.index_cast %93 : i32 to index
    %c0_69 = arith.constant 0 : index
    %99 = vector.load %arg16[%98, %c0_69] : memref<64x32xf32, #tpu.memory_space<vmem>>, vector<8x32xf32>
    %cst_70 = arith.constant dense<0.000000e+00> : vector<8x32xf32>
    %100 = tpu.matmul %89, %44, %cst_70 {dimension_numbers = #tpu.dot_dimension_numbers<[1], [0], [0], [1], [0, 0, 1, 1], [], []>} : vector<8x32xf32>, vector<32x32xf32>, vector<8x32xf32> -> vector<8x32xf32>
    %101 = arith.addf %99, %100 : vector<8x32xf32>
    %102 = arith.index_cast %93 : i32 to index
    %c0_71 = arith.constant 0 : index
    %103 = vector.load %arg17[%102, %c0_71] : memref<64x32xf32, #tpu.memory_space<vmem>>, vector<8x32xf32>
    %cst_72 = arith.constant dense<0.000000e+00> : vector<8x32xf32>
    %104 = tpu.matmul %89, %46, %cst_72 {dimension_numbers = #tpu.dot_dimension_numbers<[1], [0], [0], [1], [0, 0, 1, 1], [], []>} : vector<8x32xf32>, vector<32x32xf32>, vector<8x32xf32> -> vector<8x32xf32>
    %105 = arith.addf %103, %104 : vector<8x32xf32>
    %106 = arith.index_cast %93 : i32 to index
    %c0_73 = arith.constant 0 : index
    %107 = vector.load %arg18[%106, %c0_73] : memref<64x32xf32, #tpu.memory_space<vmem>>, vector<8x32xf32>
    %cst_74 = arith.constant dense<0.000000e+00> : vector<8x32xf32>
    %108 = tpu.matmul %89, %48, %cst_74 {dimension_numbers = #tpu.dot_dimension_numbers<[1], [0], [0], [1], [0, 0, 1, 1], [], []>} : vector<8x32xf32>, vector<32x32xf32>, vector<8x32xf32> -> vector<8x32xf32>
    %109 = arith.addf %107, %108 : vector<8x32xf32>
    %110 = arith.negf %97 : vector<8x32xf32>
    %111 = math.exp %110 : vector<8x32xf32>
    %cst_75 = arith.constant 1.000000e+00 : f32
    %112 = vector.broadcast %cst_75 : f32 to vector<8x32xf32>
    %113 = arith.addf %112, %111 : vector<8x32xf32>
    %114 = arith.divf %112, %113 : vector<8x32xf32>
    %115 = arith.negf %101 : vector<8x32xf32>
    %116 = math.exp %115 : vector<8x32xf32>
    %cst_76 = arith.constant 1.000000e+00 : f32
    %117 = vector.broadcast %cst_76 : f32 to vector<8x32xf32>
    %118 = arith.addf %117, %116 : vector<8x32xf32>
    %119 = arith.divf %117, %118 : vector<8x32xf32>
    %120 = math.tanh %105 : vector<8x32xf32>
    %121 = arith.negf %109 : vector<8x32xf32>
    %122 = math.exp %121 : vector<8x32xf32>
    %cst_77 = arith.constant 1.000000e+00 : f32
    %123 = vector.broadcast %cst_77 : f32 to vector<8x32xf32>
    %124 = arith.addf %123, %122 : vector<8x32xf32>
    %125 = arith.divf %123, %124 : vector<8x32xf32>
    %126 = arith.mulf %119, %87 : vector<8x32xf32>
    %127 = arith.mulf %114, %120 : vector<8x32xf32>
    %128 = arith.addf %126, %127 : vector<8x32xf32>
    %129 = math.tanh %128 : vector<8x32xf32>
    %130 = arith.mulf %125, %129 : vector<8x32xf32>
    %131 = arith.index_cast %93 : i32 to index
    %c0_78 = arith.constant 0 : index
    %132 = vector.load %arg19[%131, %c0_78] : memref<64x32xf32, #tpu.memory_space<vmem>>, vector<8x32xf32>
    tpu.vector_store %arg19[%131, %c0_78], %130 {strides = array<i32>} : memref<64x32xf32, #tpu.memory_space<vmem>>, vector<8x32xf32>,
    %c2_i32 = arith.constant 2 : i32
    %c8_i32_79 = arith.constant 8 : i32
    %133 = arith.muli %c2_i32, %c8_i32_79 : i32
    %134 = tpu.assume_multiple %133, 8 : i32
    %135 = arith.index_cast %134 : i32 to index
    %c0_80 = arith.constant 0 : index
    %136 = vector.load %arg15[%135, %c0_80] : memref<64x32xf32, #tpu.memory_space<vmem>>, vector<8x32xf32>
    %cst_81 = arith.constant dense<0.000000e+00> : vector<8x32xf32>
    %137 = tpu.matmul %130, %42, %cst_81 {dimension_numbers = #tpu.dot_dimension_numbers<[1], [0], [0], [1], [0, 0, 1, 1], [], []>} : vector<8x32xf32>, vector<32x32xf32>, vector<8x32xf32> -> vector<8x32xf32>
    %138 = arith.addf %136, %137 : vector<8x32xf32>
    %139 = arith.index_cast %134 : i32 to index
    %c0_82 = arith.constant 0 : index
    %140 = vector.load %arg16[%139, %c0_82] : memref<64x32xf32, #tpu.memory_space<vmem>>, vector<8x32xf32>
    %cst_83 = arith.constant dense<0.000000e+00> : vector<8x32xf32>
    %141 = tpu.matmul %130, %44, %cst_83 {dimension_numbers = #tpu.dot_dimension_numbers<[1], [0], [0], [1], [0, 0, 1, 1], [], []>} : vector<8x32xf32>, vector<32x32xf32>, vector<8x32xf32> -> vector<8x32xf32>
    %142 = arith.addf %140, %141 : vector<8x32xf32>
    %143 = arith.index_cast %134 : i32 to index
    %c0_84 = arith.constant 0 : index
    %144 = vector.load %arg17[%143, %c0_84] : memref<64x32xf32, #tpu.memory_space<vmem>>, vector<8x32xf32>
    %cst_85 = arith.constant dense<0.000000e+00> : vector<8x32xf32>
    %145 = tpu.matmul %130, %46, %cst_85 {dimension_numbers = #tpu.dot_dimension_numbers<[1], [0], [0], [1], [0, 0, 1, 1], [], []>} : vector<8x32xf32>, vector<32x32xf32>, vector<8x32xf32> -> vector<8x32xf32>
    %146 = arith.addf %144, %145 : vector<8x32xf32>
    %147 = arith.index_cast %134 : i32 to index
    %c0_86 = arith.constant 0 : index
    %148 = vector.load %arg18[%147, %c0_86] : memref<64x32xf32, #tpu.memory_space<vmem>>, vector<8x32xf32>
    %cst_87 = arith.constant dense<0.000000e+00> : vector<8x32xf32>
    %149 = tpu.matmul %130, %48, %cst_87 {dimension_numbers = #tpu.dot_dimension_numbers<[1], [0], [0], [1], [0, 0, 1, 1], [], []>} : vector<8x32xf32>, vector<32x32xf32>, vector<8x32xf32> -> vector<8x32xf32>
    %150 = arith.addf %148, %149 : vector<8x32xf32>
    %151 = arith.negf %138 : vector<8x32xf32>
    %152 = math.exp %151 : vector<8x32xf32>
    %cst_88 = arith.constant 1.000000e+00 : f32
    %153 = vector.broadcast %cst_88 : f32 to vector<8x32xf32>
    %154 = arith.addf %153, %152 : vector<8x32xf32>
    %155 = arith.divf %153, %154 : vector<8x32xf32>
    %156 = arith.negf %142 : vector<8x32xf32>
    %157 = math.exp %156 : vector<8x32xf32>
    %cst_89 = arith.constant 1.000000e+00 : f32
    %158 = vector.broadcast %cst_89 : f32 to vector<8x32xf32>
    %159 = arith.addf %158, %157 : vector<8x32xf32>
    %160 = arith.divf %158, %159 : vector<8x32xf32>
    %161 = math.tanh %146 : vector<8x32xf32>
    %162 = arith.negf %150 : vector<8x32xf32>
    %163 = math.exp %162 : vector<8x32xf32>
    %cst_90 = arith.constant 1.000000e+00 : f32
    %164 = vector.broadcast %cst_90 : f32 to vector<8x32xf32>
    %165 = arith.addf %164, %163 : vector<8x32xf32>
    %166 = arith.divf %164, %165 : vector<8x32xf32>
    %167 = arith.mulf %160, %128 : vector<8x32xf32>
    %168 = arith.mulf %155, %161 : vector<8x32xf32>
    %169 = arith.addf %167, %168 : vector<8x32xf32>
    %170 = math.tanh %169 : vector<8x32xf32>
    %171 = arith.mulf %166, %170 : vector<8x32xf32>
    %172 = arith.index_cast %134 : i32 to index
    %c0_91 = arith.constant 0 : index
    %173 = vector.load %arg19[%172, %c0_91] : memref<64x32xf32, #tpu.memory_space<vmem>>, vector<8x32xf32>
    tpu.vector_store %arg19[%172, %c0_91], %171 {strides = array<i32>} : memref<64x32xf32, #tpu.memory_space<vmem>>, vector<8x32xf32>,
    %c3_i32 = arith.constant 3 : i32
    %c8_i32_92 = arith.constant 8 : i32
    %174 = arith.muli %c3_i32, %c8_i32_92 : i32
    %175 = tpu.assume_multiple %174, 8 : i32
    %176 = arith.index_cast %175 : i32 to index
    %c0_93 = arith.constant 0 : index
    %177 = vector.load %arg15[%176, %c0_93] : memref<64x32xf32, #tpu.memory_space<vmem>>, vector<8x32xf32>
    %cst_94 = arith.constant dense<0.000000e+00> : vector<8x32xf32>
    %178 = tpu.matmul %171, %42, %cst_94 {dimension_numbers = #tpu.dot_dimension_numbers<[1], [0], [0], [1], [0, 0, 1, 1], [], []>} : vector<8x32xf32>, vector<32x32xf32>, vector<8x32xf32> -> vector<8x32xf32>
    %179 = arith.addf %177, %178 : vector<8x32xf32>
    %180 = arith.index_cast %175 : i32 to index
    %c0_95 = arith.constant 0 : index
    %181 = vector.load %arg16[%180, %c0_95] : memref<64x32xf32, #tpu.memory_space<vmem>>, vector<8x32xf32>
    %cst_96 = arith.constant dense<0.000000e+00> : vector<8x32xf32>
    %182 = tpu.matmul %171, %44, %cst_96 {dimension_numbers = #tpu.dot_dimension_numbers<[1], [0], [0], [1], [0, 0, 1, 1], [], []>} : vector<8x32xf32>, vector<32x32xf32>, vector<8x32xf32> -> vector<8x32xf32>
    %183 = arith.addf %181, %182 : vector<8x32xf32>
    %184 = arith.index_cast %175 : i32 to index
    %c0_97 = arith.constant 0 : index
    %185 = vector.load %arg17[%184, %c0_97] : memref<64x32xf32, #tpu.memory_space<vmem>>, vector<8x32xf32>
    %cst_98 = arith.constant dense<0.000000e+00> : vector<8x32xf32>
    %186 = tpu.matmul %171, %46, %cst_98 {dimension_numbers = #tpu.dot_dimension_numbers<[1], [0], [0], [1], [0, 0, 1, 1], [], []>} : vector<8x32xf32>, vector<32x32xf32>, vector<8x32xf32> -> vector<8x32xf32>
    %187 = arith.addf %185, %186 : vector<8x32xf32>
    %188 = arith.index_cast %175 : i32 to index
    %c0_99 = arith.constant 0 : index
    %189 = vector.load %arg18[%188, %c0_99] : memref<64x32xf32, #tpu.memory_space<vmem>>, vector<8x32xf32>
    %cst_100 = arith.constant dense<0.000000e+00> : vector<8x32xf32>
    %190 = tpu.matmul %171, %48, %cst_100 {dimension_numbers = #tpu.dot_dimension_numbers<[1], [0], [0], [1], [0, 0, 1, 1], [], []>} : vector<8x32xf32>, vector<32x32xf32>, vector<8x32xf32> -> vector<8x32xf32>
    %191 = arith.addf %189, %190 : vector<8x32xf32>
    %192 = arith.negf %179 : vector<8x32xf32>
    %193 = math.exp %192 : vector<8x32xf32>
    %cst_101 = arith.constant 1.000000e+00 : f32
    %194 = vector.broadcast %cst_101 : f32 to vector<8x32xf32>
    %195 = arith.addf %194, %193 : vector<8x32xf32>
    %196 = arith.divf %194, %195 : vector<8x32xf32>
    %197 = arith.negf %183 : vector<8x32xf32>
    %198 = math.exp %197 : vector<8x32xf32>
    %cst_102 = arith.constant 1.000000e+00 : f32
    %199 = vector.broadcast %cst_102 : f32 to vector<8x32xf32>
    %200 = arith.addf %199, %198 : vector<8x32xf32>
    %201 = arith.divf %199, %200 : vector<8x32xf32>
    %202 = math.tanh %187 : vector<8x32xf32>
    %203 = arith.negf %191 : vector<8x32xf32>
    %204 = math.exp %203 : vector<8x32xf32>
    %cst_103 = arith.constant 1.000000e+00 : f32
    %205 = vector.broadcast %cst_103 : f32 to vector<8x32xf32>
    %206 = arith.addf %205, %204 : vector<8x32xf32>
    %207 = arith.divf %205, %206 : vector<8x32xf32>
    %208 = arith.mulf %201, %169 : vector<8x32xf32>
    %209 = arith.mulf %196, %202 : vector<8x32xf32>
    %210 = arith.addf %208, %209 : vector<8x32xf32>
    %211 = math.tanh %210 : vector<8x32xf32>
    %212 = arith.mulf %207, %211 : vector<8x32xf32>
    %213 = arith.index_cast %175 : i32 to index
    %c0_104 = arith.constant 0 : index
    %214 = vector.load %arg19[%213, %c0_104] : memref<64x32xf32, #tpu.memory_space<vmem>>, vector<8x32xf32>
    tpu.vector_store %arg19[%213, %c0_104], %212 {strides = array<i32>} : memref<64x32xf32, #tpu.memory_space<vmem>>, vector<8x32xf32>,
    %c4_i32 = arith.constant 4 : i32
    %c8_i32_105 = arith.constant 8 : i32
    %215 = arith.muli %c4_i32, %c8_i32_105 : i32
    %216 = tpu.assume_multiple %215, 8 : i32
    %217 = arith.index_cast %216 : i32 to index
    %c0_106 = arith.constant 0 : index
    %218 = vector.load %arg15[%217, %c0_106] : memref<64x32xf32, #tpu.memory_space<vmem>>, vector<8x32xf32>
    %cst_107 = arith.constant dense<0.000000e+00> : vector<8x32xf32>
    %219 = tpu.matmul %212, %42, %cst_107 {dimension_numbers = #tpu.dot_dimension_numbers<[1], [0], [0], [1], [0, 0, 1, 1], [], []>} : vector<8x32xf32>, vector<32x32xf32>, vector<8x32xf32> -> vector<8x32xf32>
    %220 = arith.addf %218, %219 : vector<8x32xf32>
    %221 = arith.index_cast %216 : i32 to index
    %c0_108 = arith.constant 0 : index
    %222 = vector.load %arg16[%221, %c0_108] : memref<64x32xf32, #tpu.memory_space<vmem>>, vector<8x32xf32>
    %cst_109 = arith.constant dense<0.000000e+00> : vector<8x32xf32>
    %223 = tpu.matmul %212, %44, %cst_109 {dimension_numbers = #tpu.dot_dimension_numbers<[1], [0], [0], [1], [0, 0, 1, 1], [], []>} : vector<8x32xf32>, vector<32x32xf32>, vector<8x32xf32> -> vector<8x32xf32>
    %224 = arith.addf %222, %223 : vector<8x32xf32>
    %225 = arith.index_cast %216 : i32 to index
    %c0_110 = arith.constant 0 : index
    %226 = vector.load %arg17[%225, %c0_110] : memref<64x32xf32, #tpu.memory_space<vmem>>, vector<8x32xf32>
    %cst_111 = arith.constant dense<0.000000e+00> : vector<8x32xf32>
    %227 = tpu.matmul %212, %46, %cst_111 {dimension_numbers = #tpu.dot_dimension_numbers<[1], [0], [0], [1], [0, 0, 1, 1], [], []>} : vector<8x32xf32>, vector<32x32xf32>, vector<8x32xf32> -> vector<8x32xf32>
    %228 = arith.addf %226, %227 : vector<8x32xf32>
    %229 = arith.index_cast %216 : i32 to index
    %c0_112 = arith.constant 0 : index
    %230 = vector.load %arg18[%229, %c0_112] : memref<64x32xf32, #tpu.memory_space<vmem>>, vector<8x32xf32>
    %cst_113 = arith.constant dense<0.000000e+00> : vector<8x32xf32>
    %231 = tpu.matmul %212, %48, %cst_113 {dimension_numbers = #tpu.dot_dimension_numbers<[1], [0], [0], [1], [0, 0, 1, 1], [], []>} : vector<8x32xf32>, vector<32x32xf32>, vector<8x32xf32> -> vector<8x32xf32>
    %232 = arith.addf %230, %231 : vector<8x32xf32>
    %233 = arith.negf %220 : vector<8x32xf32>
    %234 = math.exp %233 : vector<8x32xf32>
    %cst_114 = arith.constant 1.000000e+00 : f32
    %235 = vector.broadcast %cst_114 : f32 to vector<8x32xf32>
    %236 = arith.addf %235, %234 : vector<8x32xf32>
    %237 = arith.divf %235, %236 : vector<8x32xf32>
    %238 = arith.negf %224 : vector<8x32xf32>
    %239 = math.exp %238 : vector<8x32xf32>
    %cst_115 = arith.constant 1.000000e+00 : f32
    %240 = vector.broadcast %cst_115 : f32 to vector<8x32xf32>
    %241 = arith.addf %240, %239 : vector<8x32xf32>
    %242 = arith.divf %240, %241 : vector<8x32xf32>
    %243 = math.tanh %228 : vector<8x32xf32>
    %244 = arith.negf %232 : vector<8x32xf32>
    %245 = math.exp %244 : vector<8x32xf32>
    %cst_116 = arith.constant 1.000000e+00 : f32
    %246 = vector.broadcast %cst_116 : f32 to vector<8x32xf32>
    %247 = arith.addf %246, %245 : vector<8x32xf32>
    %248 = arith.divf %246, %247 : vector<8x32xf32>
    %249 = arith.mulf %242, %210 : vector<8x32xf32>
    %250 = arith.mulf %237, %243 : vector<8x32xf32>
    %251 = arith.addf %249, %250 : vector<8x32xf32>
    %252 = math.tanh %251 : vector<8x32xf32>
    %253 = arith.mulf %248, %252 : vector<8x32xf32>
    %254 = arith.index_cast %216 : i32 to index
    %c0_117 = arith.constant 0 : index
    %255 = vector.load %arg19[%254, %c0_117] : memref<64x32xf32, #tpu.memory_space<vmem>>, vector<8x32xf32>
    tpu.vector_store %arg19[%254, %c0_117], %253 {strides = array<i32>} : memref<64x32xf32, #tpu.memory_space<vmem>>, vector<8x32xf32>,
    %c5_i32 = arith.constant 5 : i32
    %c8_i32_118 = arith.constant 8 : i32
    %256 = arith.muli %c5_i32, %c8_i32_118 : i32
    %257 = tpu.assume_multiple %256, 8 : i32
    %258 = arith.index_cast %257 : i32 to index
    %c0_119 = arith.constant 0 : index
    %259 = vector.load %arg15[%258, %c0_119] : memref<64x32xf32, #tpu.memory_space<vmem>>, vector<8x32xf32>
    %cst_120 = arith.constant dense<0.000000e+00> : vector<8x32xf32>
    %260 = tpu.matmul %253, %42, %cst_120 {dimension_numbers = #tpu.dot_dimension_numbers<[1], [0], [0], [1], [0, 0, 1, 1], [], []>} : vector<8x32xf32>, vector<32x32xf32>, vector<8x32xf32> -> vector<8x32xf32>
    %261 = arith.addf %259, %260 : vector<8x32xf32>
    %262 = arith.index_cast %257 : i32 to index
    %c0_121 = arith.constant 0 : index
    %263 = vector.load %arg16[%262, %c0_121] : memref<64x32xf32, #tpu.memory_space<vmem>>, vector<8x32xf32>
    %cst_122 = arith.constant dense<0.000000e+00> : vector<8x32xf32>
    %264 = tpu.matmul %253, %44, %cst_122 {dimension_numbers = #tpu.dot_dimension_numbers<[1], [0], [0], [1], [0, 0, 1, 1], [], []>} : vector<8x32xf32>, vector<32x32xf32>, vector<8x32xf32> -> vector<8x32xf32>
    %265 = arith.addf %263, %264 : vector<8x32xf32>
    %266 = arith.index_cast %257 : i32 to index
    %c0_123 = arith.constant 0 : index
    %267 = vector.load %arg17[%266, %c0_123] : memref<64x32xf32, #tpu.memory_space<vmem>>, vector<8x32xf32>
    %cst_124 = arith.constant dense<0.000000e+00> : vector<8x32xf32>
    %268 = tpu.matmul %253, %46, %cst_124 {dimension_numbers = #tpu.dot_dimension_numbers<[1], [0], [0], [1], [0, 0, 1, 1], [], []>} : vector<8x32xf32>, vector<32x32xf32>, vector<8x32xf32> -> vector<8x32xf32>
    %269 = arith.addf %267, %268 : vector<8x32xf32>
    %270 = arith.index_cast %257 : i32 to index
    %c0_125 = arith.constant 0 : index
    %271 = vector.load %arg18[%270, %c0_125] : memref<64x32xf32, #tpu.memory_space<vmem>>, vector<8x32xf32>
    %cst_126 = arith.constant dense<0.000000e+00> : vector<8x32xf32>
    %272 = tpu.matmul %253, %48, %cst_126 {dimension_numbers = #tpu.dot_dimension_numbers<[1], [0], [0], [1], [0, 0, 1, 1], [], []>} : vector<8x32xf32>, vector<32x32xf32>, vector<8x32xf32> -> vector<8x32xf32>
    %273 = arith.addf %271, %272 : vector<8x32xf32>
    %274 = arith.negf %261 : vector<8x32xf32>
    %275 = math.exp %274 : vector<8x32xf32>
    %cst_127 = arith.constant 1.000000e+00 : f32
    %276 = vector.broadcast %cst_127 : f32 to vector<8x32xf32>
    %277 = arith.addf %276, %275 : vector<8x32xf32>
    %278 = arith.divf %276, %277 : vector<8x32xf32>
    %279 = arith.negf %265 : vector<8x32xf32>
    %280 = math.exp %279 : vector<8x32xf32>
    %cst_128 = arith.constant 1.000000e+00 : f32
    %281 = vector.broadcast %cst_128 : f32 to vector<8x32xf32>
    %282 = arith.addf %281, %280 : vector<8x32xf32>
    %283 = arith.divf %281, %282 : vector<8x32xf32>
    %284 = math.tanh %269 : vector<8x32xf32>
    %285 = arith.negf %273 : vector<8x32xf32>
    %286 = math.exp %285 : vector<8x32xf32>
    %cst_129 = arith.constant 1.000000e+00 : f32
    %287 = vector.broadcast %cst_129 : f32 to vector<8x32xf32>
    %288 = arith.addf %287, %286 : vector<8x32xf32>
    %289 = arith.divf %287, %288 : vector<8x32xf32>
    %290 = arith.mulf %283, %251 : vector<8x32xf32>
    %291 = arith.mulf %278, %284 : vector<8x32xf32>
    %292 = arith.addf %290, %291 : vector<8x32xf32>
    %293 = math.tanh %292 : vector<8x32xf32>
    %294 = arith.mulf %289, %293 : vector<8x32xf32>
    %295 = arith.index_cast %257 : i32 to index
    %c0_130 = arith.constant 0 : index
    %296 = vector.load %arg19[%295, %c0_130] : memref<64x32xf32, #tpu.memory_space<vmem>>, vector<8x32xf32>
    tpu.vector_store %arg19[%295, %c0_130], %294 {strides = array<i32>} : memref<64x32xf32, #tpu.memory_space<vmem>>, vector<8x32xf32>,
    %c6_i32 = arith.constant 6 : i32
    %c8_i32_131 = arith.constant 8 : i32
    %297 = arith.muli %c6_i32, %c8_i32_131 : i32
    %298 = tpu.assume_multiple %297, 8 : i32
    %299 = arith.index_cast %298 : i32 to index
    %c0_132 = arith.constant 0 : index
    %300 = vector.load %arg15[%299, %c0_132] : memref<64x32xf32, #tpu.memory_space<vmem>>, vector<8x32xf32>
    %cst_133 = arith.constant dense<0.000000e+00> : vector<8x32xf32>
    %301 = tpu.matmul %294, %42, %cst_133 {dimension_numbers = #tpu.dot_dimension_numbers<[1], [0], [0], [1], [0, 0, 1, 1], [], []>} : vector<8x32xf32>, vector<32x32xf32>, vector<8x32xf32> -> vector<8x32xf32>
    %302 = arith.addf %300, %301 : vector<8x32xf32>
    %303 = arith.index_cast %298 : i32 to index
    %c0_134 = arith.constant 0 : index
    %304 = vector.load %arg16[%303, %c0_134] : memref<64x32xf32, #tpu.memory_space<vmem>>, vector<8x32xf32>
    %cst_135 = arith.constant dense<0.000000e+00> : vector<8x32xf32>
    %305 = tpu.matmul %294, %44, %cst_135 {dimension_numbers = #tpu.dot_dimension_numbers<[1], [0], [0], [1], [0, 0, 1, 1], [], []>} : vector<8x32xf32>, vector<32x32xf32>, vector<8x32xf32> -> vector<8x32xf32>
    %306 = arith.addf %304, %305 : vector<8x32xf32>
    %307 = arith.index_cast %298 : i32 to index
    %c0_136 = arith.constant 0 : index
    %308 = vector.load %arg17[%307, %c0_136] : memref<64x32xf32, #tpu.memory_space<vmem>>, vector<8x32xf32>
    %cst_137 = arith.constant dense<0.000000e+00> : vector<8x32xf32>
    %309 = tpu.matmul %294, %46, %cst_137 {dimension_numbers = #tpu.dot_dimension_numbers<[1], [0], [0], [1], [0, 0, 1, 1], [], []>} : vector<8x32xf32>, vector<32x32xf32>, vector<8x32xf32> -> vector<8x32xf32>
    %310 = arith.addf %308, %309 : vector<8x32xf32>
    %311 = arith.index_cast %298 : i32 to index
    %c0_138 = arith.constant 0 : index
    %312 = vector.load %arg18[%311, %c0_138] : memref<64x32xf32, #tpu.memory_space<vmem>>, vector<8x32xf32>
    %cst_139 = arith.constant dense<0.000000e+00> : vector<8x32xf32>
    %313 = tpu.matmul %294, %48, %cst_139 {dimension_numbers = #tpu.dot_dimension_numbers<[1], [0], [0], [1], [0, 0, 1, 1], [], []>} : vector<8x32xf32>, vector<32x32xf32>, vector<8x32xf32> -> vector<8x32xf32>
    %314 = arith.addf %312, %313 : vector<8x32xf32>
    %315 = arith.negf %302 : vector<8x32xf32>
    %316 = math.exp %315 : vector<8x32xf32>
    %cst_140 = arith.constant 1.000000e+00 : f32
    %317 = vector.broadcast %cst_140 : f32 to vector<8x32xf32>
    %318 = arith.addf %317, %316 : vector<8x32xf32>
    %319 = arith.divf %317, %318 : vector<8x32xf32>
    %320 = arith.negf %306 : vector<8x32xf32>
    %321 = math.exp %320 : vector<8x32xf32>
    %cst_141 = arith.constant 1.000000e+00 : f32
    %322 = vector.broadcast %cst_141 : f32 to vector<8x32xf32>
    %323 = arith.addf %322, %321 : vector<8x32xf32>
    %324 = arith.divf %322, %323 : vector<8x32xf32>
    %325 = math.tanh %310 : vector<8x32xf32>
    %326 = arith.negf %314 : vector<8x32xf32>
    %327 = math.exp %326 : vector<8x32xf32>
    %cst_142 = arith.constant 1.000000e+00 : f32
    %328 = vector.broadcast %cst_142 : f32 to vector<8x32xf32>
    %329 = arith.addf %328, %327 : vector<8x32xf32>
    %330 = arith.divf %328, %329 : vector<8x32xf32>
    %331 = arith.mulf %324, %292 : vector<8x32xf32>
    %332 = arith.mulf %319, %325 : vector<8x32xf32>
    %333 = arith.addf %331, %332 : vector<8x32xf32>
    %334 = math.tanh %333 : vector<8x32xf32>
    %335 = arith.mulf %330, %334 : vector<8x32xf32>
    %336 = arith.index_cast %298 : i32 to index
    %c0_143 = arith.constant 0 : index
    %337 = vector.load %arg19[%336, %c0_143] : memref<64x32xf32, #tpu.memory_space<vmem>>, vector<8x32xf32>
    tpu.vector_store %arg19[%336, %c0_143], %335 {strides = array<i32>} : memref<64x32xf32, #tpu.memory_space<vmem>>, vector<8x32xf32>,
    %c7_i32 = arith.constant 7 : i32
    %c8_i32_144 = arith.constant 8 : i32
    %338 = arith.muli %c7_i32, %c8_i32_144 : i32
    %339 = tpu.assume_multiple %338, 8 : i32
    %340 = arith.index_cast %339 : i32 to index
    %c0_145 = arith.constant 0 : index
    %341 = vector.load %arg15[%340, %c0_145] : memref<64x32xf32, #tpu.memory_space<vmem>>, vector<8x32xf32>
    %cst_146 = arith.constant dense<0.000000e+00> : vector<8x32xf32>
    %342 = tpu.matmul %335, %42, %cst_146 {dimension_numbers = #tpu.dot_dimension_numbers<[1], [0], [0], [1], [0, 0, 1, 1], [], []>} : vector<8x32xf32>, vector<32x32xf32>, vector<8x32xf32> -> vector<8x32xf32>
    %343 = arith.addf %341, %342 : vector<8x32xf32>
    %344 = arith.index_cast %339 : i32 to index
    %c0_147 = arith.constant 0 : index
    %345 = vector.load %arg16[%344, %c0_147] : memref<64x32xf32, #tpu.memory_space<vmem>>, vector<8x32xf32>
    %cst_148 = arith.constant dense<0.000000e+00> : vector<8x32xf32>
    %346 = tpu.matmul %335, %44, %cst_148 {dimension_numbers = #tpu.dot_dimension_numbers<[1], [0], [0], [1], [0, 0, 1, 1], [], []>} : vector<8x32xf32>, vector<32x32xf32>, vector<8x32xf32> -> vector<8x32xf32>
    %347 = arith.addf %345, %346 : vector<8x32xf32>
    %348 = arith.index_cast %339 : i32 to index
    %c0_149 = arith.constant 0 : index
    %349 = vector.load %arg17[%348, %c0_149] : memref<64x32xf32, #tpu.memory_space<vmem>>, vector<8x32xf32>
    %cst_150 = arith.constant dense<0.000000e+00> : vector<8x32xf32>
    %350 = tpu.matmul %335, %46, %cst_150 {dimension_numbers = #tpu.dot_dimension_numbers<[1], [0], [0], [1], [0, 0, 1, 1], [], []>} : vector<8x32xf32>, vector<32x32xf32>, vector<8x32xf32> -> vector<8x32xf32>
    %351 = arith.addf %349, %350 : vector<8x32xf32>
    %352 = arith.index_cast %339 : i32 to index
    %c0_151 = arith.constant 0 : index
    %353 = vector.load %arg18[%352, %c0_151] : memref<64x32xf32, #tpu.memory_space<vmem>>, vector<8x32xf32>
    %cst_152 = arith.constant dense<0.000000e+00> : vector<8x32xf32>
    %354 = tpu.matmul %335, %48, %cst_152 {dimension_numbers = #tpu.dot_dimension_numbers<[1], [0], [0], [1], [0, 0, 1, 1], [], []>} : vector<8x32xf32>, vector<32x32xf32>, vector<8x32xf32> -> vector<8x32xf32>
    %355 = arith.addf %353, %354 : vector<8x32xf32>
    %356 = arith.negf %343 : vector<8x32xf32>
    %357 = math.exp %356 : vector<8x32xf32>
    %cst_153 = arith.constant 1.000000e+00 : f32
    %358 = vector.broadcast %cst_153 : f32 to vector<8x32xf32>
    %359 = arith.addf %358, %357 : vector<8x32xf32>
    %360 = arith.divf %358, %359 : vector<8x32xf32>
    %361 = arith.negf %347 : vector<8x32xf32>
    %362 = math.exp %361 : vector<8x32xf32>
    %cst_154 = arith.constant 1.000000e+00 : f32
    %363 = vector.broadcast %cst_154 : f32 to vector<8x32xf32>
    %364 = arith.addf %363, %362 : vector<8x32xf32>
    %365 = arith.divf %363, %364 : vector<8x32xf32>
    %366 = math.tanh %351 : vector<8x32xf32>
    %367 = arith.negf %355 : vector<8x32xf32>
    %368 = math.exp %367 : vector<8x32xf32>
    %cst_155 = arith.constant 1.000000e+00 : f32
    %369 = vector.broadcast %cst_155 : f32 to vector<8x32xf32>
    %370 = arith.addf %369, %368 : vector<8x32xf32>
    %371 = arith.divf %369, %370 : vector<8x32xf32>
    %372 = arith.mulf %365, %333 : vector<8x32xf32>
    %373 = arith.mulf %360, %366 : vector<8x32xf32>
    %374 = arith.addf %372, %373 : vector<8x32xf32>
    %375 = math.tanh %374 : vector<8x32xf32>
    %376 = arith.mulf %371, %375 : vector<8x32xf32>
    %377 = arith.index_cast %339 : i32 to index
    %c0_156 = arith.constant 0 : index
    %378 = vector.load %arg19[%377, %c0_156] : memref<64x32xf32, #tpu.memory_space<vmem>>, vector<8x32xf32>
    tpu.vector_store %arg19[%377, %c0_156], %376 {strides = array<i32>} : memref<64x32xf32, #tpu.memory_space<vmem>>, vector<8x32xf32>,
    %c8_i32_157 = arith.constant 8 : i32
    %c0_158 = arith.constant 0 : index
    %c0_159 = arith.constant 0 : index
    %379 = vector.load %arg13[%c0_158, %c0_159] : memref<8x32xf32, #tpu.memory_space<vmem>>, vector<8x32xf32>
    tpu.vector_store %arg13[%c0_158, %c0_159], %376 {strides = array<i32>} : memref<8x32xf32, #tpu.memory_space<vmem>>, vector<8x32xf32>,
    %c0_160 = arith.constant 0 : index
    %c0_161 = arith.constant 0 : index
    %380 = vector.load %arg14[%c0_160, %c0_161] : memref<8x32xf32, #tpu.memory_space<vmem>>, vector<8x32xf32>
    tpu.vector_store %arg14[%c0_160, %c0_161], %374 {strides = array<i32>} : memref<8x32xf32, #tpu.memory_space<vmem>>, vector<8x32xf32>,
    %c0_162 = arith.constant 0 : index
    %c0_163 = arith.constant 0 : index
    %381 = vector.load %arg19[%c0_162, %c0_163] : memref<64x32xf32, #tpu.memory_space<vmem>>, vector<64x32xf32>
    %382 = math.tanh %381 : vector<64x32xf32>
    %c0_164 = arith.constant 0 : index
    %c0_165 = arith.constant 0 : index
    %383 = vector.load %arg8[%c0_164, %c0_165] : memref<32x32xf32, #tpu.memory_space<vmem>>, vector<32x32xf32>
    %cst_166 = arith.constant dense<0.000000e+00> : vector<64x32xf32>
    %384 = tpu.matmul %382, %383, %cst_166 {dimension_numbers = #tpu.dot_dimension_numbers<[1], [0], [0], [1], [0, 0, 1, 1], [], []>} : vector<64x32xf32>, vector<32x32xf32>, vector<64x32xf32> -> vector<64x32xf32>
    %c0_167 = arith.constant 0 : index
    %c0_168 = arith.constant 0 : index
    %385 = vector.load %arg9[%c0_167, %c0_168] : memref<1x32xf32, #tpu.memory_space<vmem>>, vector<1x32xf32>
    %386 = vector.broadcast %385 : vector<1x32xf32> to vector<64x32xf32>
    %387 = arith.addf %384, %386 : vector<64x32xf32>
    %388 = math.tanh %387 : vector<64x32xf32>
    %c0_169 = arith.constant 0 : index
    %c0_170 = arith.constant 0 : index
    %389 = vector.load %arg10[%c0_169, %c0_170] : memref<32x8xf32, #tpu.memory_space<vmem>>, vector<32x8xf32>
    %cst_171 = arith.constant dense<0.000000e+00> : vector<64x8xf32>
    %390 = tpu.matmul %388, %389, %cst_171 {dimension_numbers = #tpu.dot_dimension_numbers<[1], [0], [0], [1], [0, 0, 1, 1], [], []>} : vector<64x32xf32>, vector<32x8xf32>, vector<64x8xf32> -> vector<64x8xf32>
    %c0_172 = arith.constant 0 : index
    %c0_173 = arith.constant 0 : index
    %391 = vector.load %arg11[%c0_172, %c0_173] : memref<1x8xf32, #tpu.memory_space<vmem>>, vector<1x8xf32>
    %392 = vector.broadcast %391 : vector<1x8xf32> to vector<64x8xf32>
    %393 = arith.addf %390, %392 : vector<64x8xf32>
    %c0_174 = arith.constant 0 : index
    %c0_175 = arith.constant 0 : index
    %394 = vector.load %arg12[%c0_174, %c0_175] : memref<64x8xf32, #tpu.memory_space<vmem>>, vector<64x8xf32>
    tpu.vector_store %arg12[%c0_174, %c0_175], %393 {strides = array<i32>} : memref<64x8xf32, #tpu.memory_space<vmem>>, vector<64x8xf32>,
    return
  }
  func.func @transform_0(%arg0: i32) -> (i32, i32) {
    %c0_i32 = arith.constant 0 : i32
    %c0_i32_0 = arith.constant 0 : i32
    %c0_i32_1 = arith.constant 0 : i32
    return %c0_i32, %c0_i32_0 : i32, i32
  }
  func.func @transform_1(%arg0: i32) -> (i32, i32) {
    %c0_i32 = arith.constant 0 : i32
    %c0_i32_0 = arith.constant 0 : i32
    %c0_i32_1 = arith.constant 0 : i32
    return %c0_i32, %c0_i32_0 : i32, i32
  }
  func.func @transform_2(%arg0: i32) -> (i32, i32) {
    %c0_i32 = arith.constant 0 : i32
    %c0_i32_0 = arith.constant 0 : i32
    %c0_i32_1 = arith.constant 0 : i32
    return %c0_i32, %c0_i32_0 : i32, i32
  }
  func.func @transform_3(%arg0: i32) -> (i32, i32) {
    %c0_i32 = arith.constant 0 : i32
    %c0_i32_0 = arith.constant 0 : i32
    %c0_i32_1 = arith.constant 0 : i32
    return %c0_i32, %c0_i32_0 : i32, i32
  }
  func.func @transform_4(%arg0: i32) -> (i32, i32, i32) {
    %c0_i32 = arith.constant 0 : i32
    %c0_i32_0 = arith.constant 0 : i32
    %c0_i32_1 = arith.constant 0 : i32
    %c0_i32_2 = arith.constant 0 : i32
    return %c0_i32, %c0_i32_0, %c0_i32_1 : i32, i32, i32
  }
  func.func @transform_5(%arg0: i32) -> (i32, i32, i32) {
    %c0_i32 = arith.constant 0 : i32
    %c0_i32_0 = arith.constant 0 : i32
    %c0_i32_1 = arith.constant 0 : i32
    %c0_i32_2 = arith.constant 0 : i32
    return %c0_i32, %c0_i32_0, %c0_i32_1 : i32, i32, i32
  }
  func.func @transform_6(%arg0: i32) -> (i32, i32, i32) {
    %c0_i32 = arith.constant 0 : i32
    %c0_i32_0 = arith.constant 0 : i32
    %c0_i32_1 = arith.constant 0 : i32
    %c0_i32_2 = arith.constant 0 : i32
    return %c0_i32, %c0_i32_0, %c0_i32_1 : i32, i32, i32
  }
  func.func @transform_7(%arg0: i32) -> (i32, i32) {
    %c0_i32 = arith.constant 0 : i32
    %c0_i32_0 = arith.constant 0 : i32
    %c0_i32_1 = arith.constant 0 : i32
    return %c0_i32, %c0_i32_0 : i32, i32
  }
  func.func @transform_8(%arg0: i32) -> (i32, i32) {
    %c0_i32 = arith.constant 0 : i32
    %c0_i32_0 = arith.constant 0 : i32
    %c0_i32_1 = arith.constant 0 : i32
    return %c0_i32, %c0_i32_0 : i32, i32
  }
  func.func @transform_9(%arg0: i32) -> (i32, i32) {
    %c0_i32 = arith.constant 0 : i32
    %c0_i32_0 = arith.constant 0 : i32
    %c0_i32_1 = arith.constant 0 : i32
    return %c0_i32, %c0_i32_0 : i32, i32
  }
  func.func @transform_10(%arg0: i32) -> (i32, i32) {
    %c0_i32 = arith.constant 0 : i32
    %c0_i32_0 = arith.constant 0 : i32
    %c0_i32_1 = arith.constant 0 : i32
    return %c0_i32, %c0_i32_0 : i32, i32
  }
  func.func @transform_11(%arg0: i32) -> (i32, i32) {
    %c0_i32 = arith.constant 0 : i32
    %c0_i32_0 = arith.constant 0 : i32
    %c0_i32_1 = arith.constant 0 : i32
    return %c0_i32, %c0_i32_0 : i32, i32
  }
  func.func @transform_12(%arg0: i32) -> (i32, i32) {
    %c0_i32 = arith.constant 0 : i32
    %c0_i32_0 = arith.constant 0 : i32
    %c0_i32_1 = arith.constant 0 : i32
    return %c0_i32, %c0_i32_0 : i32, i32
  }
  func.func @transform_13(%arg0: i32) -> (i32, i32) {
    %c0_i32 = arith.constant 0 : i32
    %c0_i32_0 = arith.constant 0 : i32
    %c0_i32_1 = arith.constant 0 : i32
    return %c0_i32, %c0_i32_0 : i32, i32
  }
}

</mosaic_0001>

<bundles_post_ra>
// kernel: rnn_model_forward.1
= control target key start
LH: loop header
LB: loop body
LE: loop exit
PB: predicated region body
PF: predicated region fallthrough
CT: control target
= control target key end

     0   :  { %v4902_v0 = vmov 0   ;;  %vm119_vm0 = vcmask 1043456   ;;  %v41_v19 = vlaneseq  ;;  %vm94_vm1 = vcmask 162816   ;;  %s5599_s0 = inlined_call_operand.vmem [shape: s32[64,1], index: 0, kind: input, shape index: {}]   ;;  %s5600_s1 = inlined_call_operand.vmem [shape: f32[20,16], index: 1, kind: input, shape index: {}]   ;;  %s5601_s4 = inlined_call_operand.vmem [shape: f32[4,16,32], index: 4, kind: input, shape index: {}]   ;;  %s5602_s5 = inlined_call_operand.vmem [shape: f32[4,32,32], index: 5, kind: input, shape index: {}]   ;;  %s5603_s2 = inlined_call_operand.vmem [shape: f32[8,32], index: 2, kind: input, shape index: {}]   ;;  %s5604_s6 = inlined_call_operand.vmem [shape: f32[4,1,32], index: 6, kind: input, shape index: {}]   ;;  %s5605_s3 = inlined_call_operand.vmem [shape: f32[8,32], index: 3, kind: input, shape index: {}]   ;;  %s5606_s7 = inlined_call_operand.vmem [shape: f32[32,32], index: 7, kind: input, shape index: {}]   ;;  %s5607_s9 = inlined_call_operand.vmem [shape: f32[32,8], index: 9, kind: input, shape index: {}]   ;;  %s5608_s8 = inlined_call_operand.vmem [shape: f32[1,32], index: 8, kind: input, shape index: {}]   ;;  %s5609_s13 = inlined_call_operand.vmem [shape: f32[8,32], index: 13, kind: output, shape index: {2}]   ;;  %s5610_s12 = inlined_call_operand.vmem [shape: f32[8,32], index: 12, kind: output, shape index: {1}]   ;;  %s5611_s10 = inlined_call_operand.vmem [shape: f32[1,8], index: 10, kind: input, shape index: {}]   ;;  %s5612_s11 = inlined_call_operand.vmem [shape: f32[64,8], index: 11, kind: output, shape index: {0}]  }
   0x1   :  { %4741 = vset.pattern.permute.xlu1 %v4902_v0  ;;  %4740 = vset.pattern.permute.xlu0 %v4902_v0  ;;  %v45_v1 = vld [vmem:[%s5599_s0 + $0x10] sm:$0xff]  ;;  %v43_v2 = vld [vmem:[%s5599_s0] sm:$0xff]  ;;  %v46_v3 = vld [vmem:[%s5599_s0 + $0x18] sm:$0xff]  ;;  %v4903_v23 = vmov 0.0   ;;  %v4904_v41 = vmov 0.0|0.0   ;;  %vm237_vm10 = vcmask 130048  }
   0x2   :  { %58 = vperm.xlu1 %4741, %v45_v1   ;;  %52 = vperm.xlu0 %4740, %v43_v2   ;;  %v44_v4 = vld [vmem:[%s5599_s0 + $0x8] sm:$0xff]  ;;  %v91_v5 = vld [vmem:[%s5600_s1] sm:$0xff]  ;;  %v93_v8 = vld [vmem:[%s5600_s1 + $0x10] sm:$0xf]  ;;  %v42_v20 = vand.u32 127, %v41_v19  ;;  %vm4905_vm11 = vmmov 0  }
   0x3   :  { %v92_v6 = vld [vmem:[%s5600_s1 + $0x8] sm:$0xff]  ;;  %v47_v10 = vld [vmem:[%s5599_s0 + $0x20] sm:$0xff]  ;;  %v50_v11 = vld [vmem:[%s5599_s0 + $0x38] sm:$0xff]  ;;  %vm367_vm12 = vcmask 261120   ;;  %vm3638_vm13 = vcmask 64512  }
   0x4   :  { %v4508_v7 = vpack.c.bf16 %v92_v6, %v91_v5  ;;  %v48_v9 = vld [vmem:[%s5599_s0 + $0x28] sm:$0xff]  ;;  %v49_v12 = vld [vmem:[%s5599_s0 + $0x30] sm:$0xff]  ;;  %v3689_v13 = vld [vmem:[%s5601_s4 + $0x20] sm:$0xff] }
   0x5   :  { %v3690_v14 = vld [vmem:[%s5601_s4 + $0x28] sm:$0xff]  ;;  %v228_v15 = vld [vmem:[%s5601_s4] sm:$0xff]  ;;  %v3677_v38 = vld [vmem:[%s5601_s4 + $0x10] sm:$0xff] }
   0x6   :  { %61 = vperm.xlu1 %4741, %v46_v3   ;;  %55 = vperm.xlu0 %4740, %v44_v4   ;;  %v4520_v16 = vpack.c.bf16 %v3690_v14, %v3689_v13  ;;  %v229_v17 = vld [vmem:[%s5601_s4 + $0x8] sm:$0xff]  ;;  %v3678_v39 = vld [vmem:[%s5601_s4 + $0x18] sm:$0xff]  ;;  %v748_v42 = vld [vmem:[%s5602_s5] sm:$0xff] }
   0x7   :  { %4509 = vmatprep.subr.bf16.mxu0 %v4508_v7  ;;  %v4512_v18 = vpack.c.bf16 %v229_v17, %v228_v15  ;;  %v4516_v40 = vpack.c.bf16 %v3678_v39, %v3677_v38  ;;  %v749_v43 = vld [vmem:[%s5602_s5 + $0x8] sm:$0xff]  ;;  %v3701_v44 = vld [vmem:[%s5601_s4 + $0x30] sm:$0xff]  ;;  %v3702_v45 = vld [vmem:[%s5601_s4 + $0x38] sm:$0xff] }
   0x8   :  { %4511 = vmatpush3.bf16.msra.mxu0 %v4508_v7  ;;  %v5058_v47 = vpack.c.bf16 %v749_v43, %v748_v42  ;;  %v750_v49 = vld [vmem:[%s5602_s5 + $0x10] sm:$0xff]  ;;  %v751_v50 = vld [vmem:[%s5602_s5 + $0x18] sm:$0xff]  ;;  %v4524_v51 = vpack.c.bf16 %v3702_v45, %v3701_v44  ;;  %v3713_v59 = vld [vmem:[%s5602_s5 + $0x20] sm:$0xff] }
   0x9   :  { %4038 = vmatprep.subr.msk.mxu0 %vm119_vm0, %v93_v8  ;;  %4513 = vmatprep.subr.bf16.mxu1 %v4512_v18  ;;  %v5079_v53 = vpack.c.bf16 %v751_v50, %v750_v49  ;;  %v3714_v60 = vld [vmem:[%s5602_s5 + $0x28] sm:$0xff]  ;;  %v767_v61 = vld [vmem:[%s5603_s2] sm:$0xff]  ;;  %v3715_v63 = vld [vmem:[%s5602_s5 + $0x30] sm:$0xff] }
   0xa   :  { %67 = vperm.xlu1 %4741, %v48_v9   ;;  %64 = vperm.xlu0 %4740, %v47_v10   ;;  %v5131_v62 = vpack.c.bf16 %v3714_v60, %v3713_v59  ;;  %v3716_v0 = vld [vmem:[%s5602_s5 + $0x38] sm:$0xff]  ;;  %v3721_v2 = vld [vmem:[%s5602_s5 + $0x60] sm:$0xff]  ;;  %v3722_v3 = vld [vmem:[%s5602_s5 + $0x68] sm:$0xff] }
   0xb   :  { %4515 = vmatpush3.bf16.msra.mxu1 %v4512_v18  ;;  %v5145_v1 = vpack.c.bf16 %v3716_v0, %v3715_v63  ;;  %v5162_v4 = vpack.c.bf16 %v3722_v3, %v3721_v2  ;;  %v3723_v5 = vld [vmem:[%s5602_s5 + $0x70] sm:$0xff]  ;;  %v3724_v6 = vld [vmem:[%s5602_s5 + $0x78] sm:$0xff]  ;;  %v3717_v7 = vld [vmem:[%s5602_s5 + $0x40] sm:$0xff] }
   0xc   :  { %4039 = vmatpush3.msk.msra.mxu0 %vm119_vm0, %v93_v8  ;;  %4517 = vmatprep.subr.bf16.mxu1 %v4516_v40  ;;  %v3718_v8 = vld [vmem:[%s5602_s5 + $0x48] sm:$0xff]  ;;  %v5183_v9 = vpack.c.bf16 %v3724_v6, %v3723_v5  ;;  %v3668_v14 = vld [vmem:[%s5604_s6] ss:$0 sm:$0xff]  ;;  %v3692_v15 = vld [vmem:[%s5604_s6 + $0x2] ss:$0 sm:$0xff] }
   0xd   :  { %4521 = vmatprep.subr.bf16.mxu0 %v4520_v16  ;;  %v5192_v10 = vpack.c.bf16 %v3718_v8, %v3717_v7 }
   0xe   :  { %73 = vperm.xlu1 %4741, %v50_v11   ;;  %70 = vperm.xlu0 %4740, %v49_v12   ;;  %v3719_v11 = vld [vmem:[%s5602_s5 + $0x50] sm:$0xff]  ;;  %v3720_v12 = vld [vmem:[%s5602_s5 + $0x58] sm:$0xff] }
   0xf   :  { %v5207_v13 = vpack.c.bf16 %v3720_v12, %v3719_v11 }
  0x81   :  { %v59_v21 = vpop.permute.xlu1 %58  ;;  %v53_v22 = vpop.permute.xlu0 %52 }
  0x82   :  { %vm75_vm2 = vcmp.eq.s32.totalorder %v53_v22, %v42_v20  ;;  %vm77_vm3 = vcmp.eq.s32.totalorder %v59_v21, %v42_v20 }
  0x83   :  { %v83_v24 = vsel %vm75_vm2, 1.0, %v4903_v23  ;;  %v85_v27 = vsel %vm77_vm3, 1.0, %v4903_v23 }
  0x84   :  { %4040 = vmatprep.mubr.msk.f32.mxu0 %vm94_vm1, %v83_v24 }
  0x85   :  { %v62_v25 = vpop.permute.xlu1 %61  ;;  %v56_v26 = vpop.permute.xlu0 %55 }
  0x86   :  { %vm76_vm4 = vcmp.eq.s32.totalorder %v56_v26, %v42_v20  ;;  %vm78_vm5 = vcmp.eq.s32.totalorder %v62_v25, %v42_v20 }
  0x87   :  { %v84_v28 = vsel %vm76_vm4, 1.0, %v4903_v23  ;;  %v86_v31 = vsel %vm78_vm5, 1.0, %v4903_v23 }
  0x88   :  { %4041 = vmatmul.mubr.msk.f32.vlgmr.msra.gmra.mrb[0].mxu0 %vm94_vm1, %v84_v28 }
  0x89   :  { %v68_v29 = vpop.permute.xlu1 %67  ;;  %4043 = vmatprep.mubr.msk.f32.mxu0 %vm94_vm1, %v85_v27  ;;  %v65_v30 = vpop.permute.xlu0 %64  ;;  %4523 = vmatpush3.bf16.msra.mxu0 %v4520_v16 }
  0x8a   :  { %vm79_vm6 = vcmp.eq.s32.totalorder %v65_v30, %v42_v20  ;;  %vm80_vm7 = vcmp.eq.s32.totalorder %v68_v29, %v42_v20  ;;  %4528 = vmatprep.subr.bf16.mxu0 %v4904_v41 }
  0x8b   :  { %v87_v32 = vsel %vm79_vm6, 1.0, %v4903_v23  ;;  %v88_v35 = vsel %vm80_vm7, 1.0, %v4903_v23 }
  0x8c   :  { %4044 = vmatmul.mubr.msk.f32.gmra.mrb[2].mxu0 %vm94_vm1, %v86_v31 }
  0x8d   :  { %v74_v33 = vpop.permute.xlu1 %73  ;;  %4046 = vmatprep.mubr.msk.f32.mxu0 %vm94_vm1, %v87_v32  ;;  %v71_v34 = vpop.permute.xlu0 %70 }
  0x8e   :  { %vm81_vm8 = vcmp.eq.s32.totalorder %v71_v34, %v42_v20  ;;  %vm82_vm9 = vcmp.eq.s32.totalorder %v74_v33, %v42_v20 }
  0x8f   :  { %v89_v36 = vsel %vm81_vm8, 1.0, %v4903_v23  ;;  %v90_v37 = vsel %vm82_vm9, 1.0, %v4903_v23 }
  0x90   :  { %4047 = vmatmul.mubr.msk.f32.gmra.mrb[4].mxu0 %vm94_vm1, %v88_v35 }
  0x91   :  { %4049 = vmatprep.mubr.msk.f32.mxu0 %vm94_vm1, %v89_v36 }
  0x94   :  { %4050 = vmatmul.mubr.msk.f32.gmra.mrb[6].mxu0 %vm94_vm1, %v90_v37 }
 0x15b   :  { %v5056_v46 = vpop.f32.mrb[0].mxu0 }
 0x15c   :  { %v5060_v48 = vpop.f32.mrb[1].mxu0 }
 0x15d   :  { %4056 = vmatprep.mubr.msk.f32.mxu1 %vm237_vm10, %v5060_v48  ;;  %4088 = vmatprep.mubr.msk.f32.mxu0 %vm237_vm10, %v5060_v48 }
 0x15e   :  { %4057 = vmatmul.mubr.msk.f32.vlgmr.msra.gmra.mrb[0].mxu1 %vm237_vm10, %v5056_v46  ;;  %4089 = vmatmul.mubr.msk.f32.vlgmr.msra.gmra.mrb[8].mxu0 %vm237_vm10, %v5056_v46 }
 0x15f   :  { %4519 = vmatpush3.bf16.msra.mxu1 %v4516_v40  ;;  %v5076_v52 = vpop.f32.mrb[2].mxu0  ;;  %4530 = vmatpush3.bf16.msra.mxu0 %v5058_v47 }
 0x160   :  { %v5081_v54 = vpop.f32.mrb[3].mxu0  ;;  %4531 = vmatprep.subr.bf16.mxu0 %v4904_v41  ;;  %4525 = vmatprep.subr.bf16.mxu1 %v4524_v51 }
 0x161   :  { %4059 = vmatprep.mubr.msk.f32.mxu1 %vm237_vm10, %v5081_v54  ;;  %4091 = vmatprep.mubr.msk.f32.mxu0 %vm237_vm10, %v5081_v54 }
 0x162   :  { %4060 = vmatmul.mubr.msk.f32.gmra.mrb[2].mxu1 %vm237_vm10, %v5076_v52  ;;  %4092 = vmatmul.mubr.msk.f32.gmra.mrb[10].mxu0 %vm237_vm10, %v5076_v52 }
 0x163   :  { %v5092_v55 = vpop.f32.mrb[4].mxu0  ;;  %4533 = vmatpush3.bf16.msra.mxu0 %v5079_v53 }
 0x164   :  { %v5095_v56 = vpop.f32.mrb[5].mxu0  ;;  %4534 = vmatprep.subr.bf16.mxu0 %v4904_v41 }
 0x165   :  { %4062 = vmatprep.mubr.msk.f32.mxu1 %vm237_vm10, %v5095_v56  ;;  %4094 = vmatprep.mubr.msk.f32.mxu0 %vm237_vm10, %v5095_v56 }
 0x166   :  { %4063 = vmatmul.mubr.msk.f32.gmra.mrb[4].mxu1 %vm237_vm10, %v5092_v55  ;;  %4095 = vmatmul.mubr.msk.f32.gmra.mrb[12].mxu0 %vm237_vm10, %v5092_v55 }
 0x167   :  { %v5106_v57 = vpop.f32.mrb[6].mxu0 }
 0x168   :  { %v5108_v58 = vpop.f32.mrb[7].mxu0 }
 0x169   :  { %4065 = vmatprep.mubr.msk.f32.mxu1 %vm237_vm10, %v5108_v58  ;;  %4097 = vmatprep.mubr.msk.f32.mxu0 %vm237_vm10, %v5108_v58 }
 0x16a   :  { %4066 = vmatmul.mubr.msk.f32.gmra.mrb[6].mxu1 %vm237_vm10, %v5106_v57  ;;  %4098 = vmatmul.mubr.msk.f32.gmra.mrb[14].mxu0 %vm237_vm10, %v5106_v57 }
 0x16b   :  { %4072 = vmatprep.mubr.msk.f32.mxu1 %vm237_vm10, %v5060_v48  ;;  %4124 = vmatprep.mubr.msk.f32.mxu0 %vm4905_vm11, %v4903_v23 }
 0x16e   :  { %4073 = vmatmul.mubr.msk.f32.vlgmr.msra.gmra.mrb[8].mxu1 %vm237_vm10, %v5056_v46  ;;  %4125 = vmatmul.mubr.msk.f32.vlgmr.msra.gmra.mrb[16].mxu0 %vm367_vm12, %v767_v61 }
 0x16f   :  { %4527 = vmatpush3.bf16.msra.mxu1 %v4524_v51  ;;  %4075 = vmatprep.mubr.msk.f32.mxu1 %vm237_vm10, %v5081_v54  ;;  %v3680_v51 = vld [vmem:[%s5604_s6 + $0x1] ss:$0 sm:$0xff] }
 0x170   :  { %4536 = vmatpush3.bf16.msra.mxu0 %v5131_v62  ;;  %4135 = vmatprep.mubr.msk.f32.mxu0 %vm4905_vm11, %v4903_v23 }
 0x171   :  { %4537 = vmatprep.subr.bf16.mxu0 %v4904_v41  ;;  %4540 = vmatprep.subr.bf16.mxu1 %v4904_v41 }
 0x172   :  { %4076 = vmatmul.mubr.msk.f32.gmra.mrb[10].mxu1 %vm237_vm10, %v5076_v52 }
 0x173   :  { %4078 = vmatprep.mubr.msk.f32.mxu1 %vm237_vm10, %v5095_v56 }
 0x174   :  { %4539 = vmatpush3.bf16.msra.mxu0 %v5145_v1 }
 0x175   :  { %4546 = vmatprep.subr.bf16.mxu0 %v4904_v41 }
 0x176   :  { %4079 = vmatmul.mubr.msk.f32.gmra.mrb[12].mxu1 %vm237_vm10, %v5092_v55 }
 0x177   :  { %4081 = vmatprep.mubr.msk.f32.mxu1 %vm237_vm10, %v5108_v58  ;;  %4136 = vmatmul.mubr.msk.f32.vlgmr.msra.gmra.mrb[18].mxu0 %vm367_vm12, %v767_v61 }
 0x178   :  { %4548 = vmatpush3.bf16.msra.mxu0 %v5162_v4  ;;  %4157 = vmatprep.mubr.msk.f32.mxu0 %vm4905_vm11, %v4903_v23 }
 0x179   :  { %4549 = vmatprep.subr.bf16.mxu0 %v4904_v41 }
 0x17a   :  { %4082 = vmatmul.mubr.msk.f32.gmra.mrb[14].mxu1 %vm237_vm10, %v5106_v57 }
 0x17b   :  { %4104 = vmatprep.mubr.msk.f32.mxu1 %vm237_vm10, %v5060_v48 }
 0x17c   :  { %4551 = vmatpush3.bf16.msra.mxu0 %v5183_v9 }
 0x17d   :  { %4558 = vmatprep.subr.bf16.mxu0 %v4904_v41 }
 0x17e   :  { %4105 = vmatmul.mubr.msk.f32.vlgmr.msra.gmra.mrb[16].mxu1 %vm237_vm10, %v5056_v46 }
 0x17f   :  { %4542 = vmatpush3.bf16.msra.mxu1 %v5192_v10  ;;  %4107 = vmatprep.mubr.msk.f32.mxu1 %vm237_vm10, %v5081_v54 }
 0x180   :  { %4543 = vmatprep.subr.bf16.mxu1 %v4904_v41  ;;  %4158 = vmatmul.mubr.msk.f32.vlgmr.msra.gmra.mrb[20].mxu0 %vm367_vm12, %v767_v61 }
 0x181   :  { %4560 = vmatpush3.bf16.msra.mxu0 %v5131_v62  ;;  %4179 = vmatprep.mubr.msk.f32.mxu0 %vm4905_vm11, %v4903_v23 }
 0x182   :  { %4108 = vmatmul.mubr.msk.f32.gmra.mrb[18].mxu1 %vm237_vm10, %v5076_v52  ;;  %4561 = vmatprep.subr.bf16.mxu0 %v4904_v41 }
 0x183   :  { %4110 = vmatprep.mubr.msk.f32.mxu1 %vm237_vm10, %v5095_v56  ;;  %4545 = vmatpush3.bf16.msra.mxu1 %v5207_v13 }
 0x184   :  { %4552 = vmatprep.subr.bf16.mxu1 %v4904_v41 }
 0x185   :  { %4563 = vmatpush3.bf16.msra.mxu0 %v5145_v1 }
 0x186   :  { %4111 = vmatmul.mubr.msk.f32.gmra.mrb[20].mxu1 %vm237_vm10, %v5092_v55  ;;  %4570 = vmatprep.subr.bf16.mxu0 %v4904_v41 }
 0x187   :  { %4113 = vmatprep.mubr.msk.f32.mxu1 %vm237_vm10, %v5108_v58 }
 0x18a   :  { %4114 = vmatmul.mubr.msk.f32.gmra.mrb[22].mxu1 %vm237_vm10, %v5106_v57 }
 0x18b   :  { %4146 = vmatprep.mubr.msk.f32.mxu1 %vm4905_vm11, %v4903_v23 }
 0x18e   :  { %4147 = vmatmul.mubr.msk.f32.vlgmr.msra.gmra.mrb[24].mxu1 %vm367_vm12, %v767_v61 }
 0x18f   :  { %4554 = vmatpush3.bf16.msra.mxu1 %v5058_v47  ;;  %4168 = vmatprep.mubr.msk.f32.mxu1 %vm4905_vm11, %v4903_v23 }
 0x190   :  { %4555 = vmatprep.subr.bf16.mxu1 %v4904_v41 }
 0x193   :  { %4557 = vmatpush3.bf16.msra.mxu1 %v5079_v53 }
 0x194   :  { %4564 = vmatprep.subr.bf16.mxu1 %v4904_v41 }
 0x231   :  { %v4058_v16 = vpop.f32.mrb[0].mxu1  ;;  %v4090_v17 = vpop.f32.mrb[8].mxu0 }
 0x232   :  { %v334_v18 = vadd.f32 %v4058_v16, %v3668_v14  ;;  %v583_v19 = vadd.f32 %v4090_v17, %v3692_v15  ;;  %v328_v20 = vpop.f32.mrb[1].mxu1  ;;  %v577_v21 = vpop.f32.mrb[9].mxu0 }
 0x233   :  { %v329_v22 = vadd.f32 %v3668_v14, %v328_v20  ;;  %v578_v24 = vadd.f32 %v3692_v15, %v577_v21  ;;  %v3704_v21 = vld [vmem:[%s5604_s6 + $0x3] ss:$0 sm:$0xff] }
 0x234   :  { %369 = vst.msk [vmem:[#allocation2 + $0x8] sm:$0xff] %vm367_vm12, %v334_v18  ;;  %617 = vst.msk [vmem:[#allocation4 + $0x8] sm:$0xff] %vm367_vm12, %v583_v19 }
 0x235   :  { %368 = vst.msk [vmem:[#allocation2] sm:$0xff] %vm367_vm12, %v329_v22  ;;  %616 = vst.msk [vmem:[#allocation4] sm:$0xff] %vm367_vm12, %v578_v24  ;;  %v4061_v25 = vpop.f32.mrb[2].mxu1  ;;  %v4093_v26 = vpop.f32.mrb[10].mxu0 }
 0x236   :  { %v344_v27 = vadd.f32 %v4061_v25, %v3668_v14  ;;  %v593_v28 = vadd.f32 %v4093_v26, %v3692_v15  ;;  %v338_v29 = vpop.f32.mrb[3].mxu1  ;;  %v587_v30 = vpop.f32.mrb[11].mxu0 }
 0x237   :  { %v339_v31 = vadd.f32 %v3668_v14, %v338_v29  ;;  %v588_v32 = vadd.f32 %v3692_v15, %v587_v30 }
 0x238   :  { %371 = vst.msk [vmem:[#allocation2 + $0x18] sm:$0xff] %vm367_vm12, %v344_v27  ;;  %619 = vst.msk [vmem:[#allocation4 + $0x18] sm:$0xff] %vm367_vm12, %v593_v28 }
 0x239   :  { %370 = vst.msk [vmem:[#allocation2 + $0x10] sm:$0xff] %vm367_vm12, %v339_v31  ;;  %618 = vst.msk [vmem:[#allocation4 + $0x10] sm:$0xff] %vm367_vm12, %v588_v32  ;;  %v4064_v33 = vpop.f32.mrb[4].mxu1  ;;  %v4096_v34 = vpop.f32.mrb[12].mxu0 }
 0x23a   :  { %v354_v35 = vadd.f32 %v4064_v33, %v3668_v14  ;;  %v603_v36 = vadd.f32 %v4096_v34, %v3692_v15  ;;  %v348_v37 = vpop.f32.mrb[5].mxu1  ;;  %v597_v38 = vpop.f32.mrb[13].mxu0 }
 0x23b   :  { %v349_v39 = vadd.f32 %v3668_v14, %v348_v37  ;;  %v598_v40 = vadd.f32 %v3692_v15, %v597_v38 }
 0x23c   :  { %373 = vst.msk [vmem:[#allocation2 + $0x28] sm:$0xff] %vm367_vm12, %v354_v35  ;;  %621 = vst.msk [vmem:[#allocation4 + $0x28] sm:$0xff] %vm367_vm12, %v603_v36  ;;  %v769_v0 = vld [vmem:[#allocation2] sm:$0xff] }
 0x23d   :  { %372 = vst.msk [vmem:[#allocation2 + $0x20] sm:$0xff] %vm367_vm12, %v349_v39  ;;  %620 = vst.msk [vmem:[#allocation4 + $0x20] sm:$0xff] %vm367_vm12, %v598_v40  ;;  %v4067_v42 = vpop.f32.mrb[6].mxu1  ;;  %v4099_v43 = vpop.f32.mrb[14].mxu0 }
 0x23e   :  { %v364_v44 = vadd.f32 %v4067_v42, %v3668_v14  ;;  %v613_v45 = vadd.f32 %v4099_v43, %v3692_v15  ;;  %v358_v46 = vpop.f32.mrb[7].mxu1  ;;  %v607_v48 = vpop.f32.mrb[15].mxu0 }
 0x23f   :  { %v359_v49 = vadd.f32 %v3668_v14, %v358_v46  ;;  %v608_v50 = vadd.f32 %v3692_v15, %v607_v48 }
 0x240   :  { %375 = vst.msk [vmem:[#allocation2 + $0x38] sm:$0xff] %vm367_vm12, %v364_v44  ;;  %623 = vst.msk [vmem:[#allocation4 + $0x38] sm:$0xff] %vm367_vm12, %v613_v45 }
 0x241   :  { %374 = vst.msk [vmem:[#allocation2 + $0x30] sm:$0xff] %vm367_vm12, %v359_v49  ;;  %622 = vst.msk [vmem:[#allocation4 + $0x30] sm:$0xff] %vm367_vm12, %v608_v50  ;;  %v4074_v52 = vpop.f32.mrb[8].mxu1  ;;  %v839_v54 = vpop.f32.mrb[16].mxu0  ;;  %v916_v50 = vld [vmem:[#allocation4] sm:$0xff] }
 0x242   :  { %v459_v55 = vadd.f32 %v4074_v52, %v3680_v51  ;;  %v453_v56 = vpop.f32.mrb[9].mxu1  ;;  %v4126_v57 = vpop.f32.mrb[17].mxu0  ;;  %v843_v3 = vadd.f32 %v839_v54, %v769_v0 }
 0x243   :  { %v454_v58 = vadd.f32 %v3680_v51, %v453_v56  ;;  %v768_v57 = vld [vmem:[%s5605_s3] sm:$0xff] }
 0x244   :  { %493 = vst.msk [vmem:[#allocation3 + $0x8] sm:$0xff] %vm367_vm12, %v459_v55  ;;  %v3729_v16 = vmul.f32 -1.442695, %v843_v3 }
 0x245   :  { %492 = vst.msk [vmem:[#allocation3] sm:$0xff] %vm367_vm12, %v454_v58  ;;  %v4077_v59 = vpop.f32.mrb[10].mxu1 }
 0x246   :  { %v469_v60 = vadd.f32 %v4077_v59, %v3680_v51  ;;  %v463_v61 = vpop.f32.mrb[11].mxu1 }
 0x247   :  { %v464_v63 = vadd.f32 %v3680_v51, %v463_v61 }
 0x248   :  { %495 = vst.msk [vmem:[#allocation3 + $0x18] sm:$0xff] %vm367_vm12, %v469_v60 }
 0x249   :  { %494 = vst.msk [vmem:[#allocation3 + $0x10] sm:$0xff] %vm367_vm12, %v464_v63  ;;  %v4080_v2 = vpop.f32.mrb[12].mxu1 }
 0x24a   :  { %v479_v5 = vadd.f32 %v4080_v2, %v3680_v51  ;;  %v473_v6 = vpop.f32.mrb[13].mxu1  ;;  %v911_v7 = vpop.f32.mrb[18].mxu0 }
 0x24b   :  { %v474_v8 = vadd.f32 %v3680_v51, %v473_v6  ;;  %v4137_v11 = vpop.f32.mrb[19].mxu0  ;;  %v1086_v6 = vld [vmem:[#allocation2 + $0x8] sm:$0xff] }
 0x24c   :  { %497 = vst.msk [vmem:[#allocation3 + $0x28] sm:$0xff] %vm367_vm12, %v479_v5  ;;  %v844_v12 = vld [vmem:[#allocation3] sm:$0xff] }
 0x24d   :  { %496 = vst.msk [vmem:[#allocation3 + $0x20] sm:$0xff] %vm367_vm12, %v474_v8  ;;  %v915_v14 = vadd.f32 %v911_v7, %v844_v12  ;;  %v4083_v15 = vpop.f32.mrb[14].mxu1  ;;  %v1162_v8 = vld [vmem:[#allocation3 + $0x8] sm:$0xff] }
 0x24e   :  { %v489_v17 = vadd.f32 %v4083_v15, %v3680_v51  ;;  %v483_v18 = vpop.f32.mrb[15].mxu1 }
 0x24f   :  { %v3730_v19 = vmul.f32 -1.442695, %v915_v14  ;;  %v484_v20 = vadd.f32 %v3680_v51, %v483_v18 }
 0x250   :  { %499 = vst.msk [vmem:[#allocation3 + $0x38] sm:$0xff] %vm367_vm12, %v489_v17 }
 0x251   :  { %4742 = vpow2.f32 %v3730_v19  ;;  %498 = vst.msk [vmem:[#allocation3 + $0x30] sm:$0xff] %vm367_vm12, %v484_v20  ;;  %v4106_v22 = vpop.f32.mrb[16].mxu1 }
 0x252   :  { %4744 = vpow2.f32 %v3729_v16  ;;  %v707_v24 = vadd.f32 %v4106_v22, %v3704_v21  ;;  %v701_v25 = vpop.f32.mrb[17].mxu1 }
 0x253   :  { %v702_v26 = vadd.f32 %v3704_v21, %v701_v25  ;;  %v1055_v27 = vpop.f32.mrb[20].mxu0 }
 0x254   :  { %741 = vst.msk [vmem:[#allocation5 + $0x8] sm:$0xff] %vm367_vm12, %v707_v24  ;;  %v4159_v28 = vpop.f32.mrb[21].mxu0 }
 0x255   :  { %740 = vst.msk [vmem:[#allocation5] sm:$0xff] %vm367_vm12, %v702_v26  ;;  %v4109_v29 = vpop.f32.mrb[18].mxu1  ;;  %v1235_v26 = vld [vmem:[#allocation4 + $0x8] sm:$0xff] }
 0x256   :  { %v717_v30 = vadd.f32 %v4109_v29, %v3704_v21  ;;  %v711_v31 = vpop.f32.mrb[19].mxu1 }
 0x257   :  { %v712_v32 = vadd.f32 %v3704_v21, %v711_v31 }
 0x258   :  { %743 = vst.msk [vmem:[#allocation5 + $0x18] sm:$0xff] %vm367_vm12, %v717_v30 }
 0x259   :  { %742 = vst.msk [vmem:[#allocation5 + $0x10] sm:$0xff] %vm367_vm12, %v712_v32  ;;  %v4112_v33 = vpop.f32.mrb[20].mxu1 }
 0x25a   :  { %v727_v34 = vadd.f32 %v4112_v33, %v3704_v21  ;;  %v721_v35 = vpop.f32.mrb[21].mxu1 }
 0x25b   :  { %v4743_v36 = vpop.eup %4742  ;;  %v722_v37 = vadd.f32 %v3704_v21, %v721_v35  ;;  %v1308_v20 = vld [vmem:[#allocation5 + $0x8] sm:$0xff] }
 0x25c   :  { %v4745_v38 = vpop.eup %4744  ;;  %745 = vst.msk [vmem:[#allocation5 + $0x28] sm:$0xff] %vm367_vm12, %v727_v34  ;;  %v988_v39 = vld [vmem:[#allocation5] sm:$0xff]  ;;  %v1069_v43 = vadd.f32 1.0, %v4743_v36 }
 0x25d   :  { %744 = vst.msk [vmem:[#allocation5 + $0x20] sm:$0xff] %vm367_vm12, %v722_v37  ;;  %v1059_v40 = vadd.f32 %v1055_v27, %v988_v39  ;;  %v4115_v42 = vpop.f32.mrb[22].mxu1  ;;  %v1063_v46 = vadd.f32 1.0, %v4745_v38 }
 0x25e   :  { %v737_v44 = vadd.f32 %v4115_v42, %v3704_v21  ;;  %v731_v45 = vpop.f32.mrb[23].mxu1 }
 0x25f   :  { %v3731_v48 = vmul.f32 -1.442695, %v1059_v40  ;;  %v732_v49 = vadd.f32 %v3704_v21, %v731_v45  ;;  %v1407_v45 = vld [vmem:[#allocation2 + $0x10] sm:$0xff] }
 0x260   :  { %747 = vst.msk [vmem:[#allocation5 + $0x38] sm:$0xff] %vm367_vm12, %v737_v44 }
 0x261   :  { %4746 = vpow2.f32 %v3731_v48  ;;  %746 = vst.msk [vmem:[#allocation5 + $0x30] sm:$0xff] %vm367_vm12, %v732_v49  ;;  %v983_v51 = vpop.f32.mrb[24].mxu1  ;;  %v1483_v48 = vld [vmem:[#allocation3 + $0x10] sm:$0xff] }
 0x262   :  { %4748 = vrcp.f32 %v1069_v43  ;;  %v987_v52 = vadd.f32 %v983_v51, %v916_v50  ;;  %v4148_v54 = vpop.f32.mrb[25].mxu1 }
 0x263   :  { %4750 = vrcp.f32 %v1063_v46 }
 0x264   :  { %4752 = vtanh.f32 %v987_v52 }
 0x26b   :  { %v4747_v55 = vpop.eup %4746 }
 0x26c   :  { %v4749_v56 = vpop.eup %4748  ;;  %v1076_v60 = vadd.f32 1.0, %v4747_v55 }
 0x26d   :  { %v4751_v58 = vpop.eup %4750  ;;  %v1079_v61 = vmul.f32 %v4749_v56, %v768_v57 }
 0x26e   :  { %v4753_v59 = vpop.eup %4752  ;;  %4754 = vrcp.f32 %v1076_v60 }
 0x26f   :  { %v1080_v63 = vmul.f32 %v4753_v59, %v4751_v58  ;;  %v1629_v58 = vld [vmem:[#allocation5 + $0x10] sm:$0xff] }
 0x271   :  { %v5285_v0 = vadd.f32 %v1080_v63, %v1079_v61 }
 0x273   :  { %4756 = vtanh.f32 %v5285_v0 }
 0x278   :  { %v4755_v2 = vpop.eup %4754 }
 0x27d   :  { %v4757_v3 = vpop.eup %4756 }
 0x27e   :  { %v1083_v5 = vmul.f32 %v4757_v3, %v4755_v2 }
 0x280   :  { %1084 = vst.msk [vmem:[#allocation6] sm:$0xff] %vm367_vm12, %v1083_v5  ;;  %4169 = vmatmul.mubr.msk.f32.vlgmr.msra.gmra.mrb[26].mxu1 %vm367_vm12, %v1083_v5  ;;  %4180 = vmatmul.mubr.msk.f32.vlgmr.msra.gmra.mrb[22].mxu0 %vm367_vm12, %v1083_v5 }
 0x281   :  { %4566 = vmatpush3.bf16.msra.mxu1 %v5192_v10  ;;  %4572 = vmatpush3.bf16.msra.mxu0 %v5162_v4 }
 0x282   :  { %4567 = vmatprep.subr.bf16.mxu1 %v4904_v41  ;;  %4573 = vmatprep.subr.bf16.mxu0 %v4904_v41 }
 0x283   :  { %4190 = vmatprep.mubr.msk.f32.mxu1 %vm4905_vm11, %v4903_v23  ;;  %4201 = vmatprep.mubr.msk.f32.mxu0 %vm4905_vm11, %v4903_v23 }
 0x285   :  { %4569 = vmatpush3.bf16.msra.mxu1 %v5207_v13  ;;  %4575 = vmatpush3.bf16.msra.mxu0 %v5183_v9 }
 0x286   :  { %4576 = vmatprep.subr.bf16.mxu1 %v4904_v41  ;;  %4582 = vmatprep.subr.bf16.mxu0 %v4904_v41 }
 0x288   :  { %4191 = vmatmul.mubr.msk.f32.vlgmr.msra.gmra.mrb[28].mxu1 %vm367_vm12, %v1083_v5  ;;  %4202 = vmatmul.mubr.msk.f32.vlgmr.msra.gmra.mrb[24].mxu0 %vm367_vm12, %v1083_v5 }
 0x289   :  { %4578 = vmatpush3.bf16.msra.mxu1 %v5058_v47  ;;  %4584 = vmatpush3.bf16.msra.mxu0 %v5131_v62 }
 0x28a   :  { %4579 = vmatprep.subr.bf16.mxu1 %v4904_v41  ;;  %4585 = vmatprep.subr.bf16.mxu0 %v4904_v41 }
 0x28b   :  { %4212 = vmatprep.mubr.msk.f32.mxu1 %vm4905_vm11, %v4903_v23  ;;  %4223 = vmatprep.mubr.msk.f32.mxu0 %vm4905_vm11, %v4903_v23 }
 0x28d   :  { %4581 = vmatpush3.bf16.msra.mxu1 %v5079_v53  ;;  %4587 = vmatpush3.bf16.msra.mxu0 %v5145_v1 }
 0x28e   :  { %4588 = vmatprep.subr.bf16.mxu1 %v4904_v41  ;;  %4594 = vmatprep.subr.bf16.mxu0 %v4904_v41 }
 0x353   :  { %v1156_v7 = vpop.f32.mrb[26].mxu1  ;;  %v1229_v11 = vpop.f32.mrb[22].mxu0 }
 0x354   :  { %v1160_v12 = vadd.f32 %v1156_v7, %v1086_v6  ;;  %v1233_v14 = vadd.f32 %v1229_v11, %v1162_v8  ;;  %v4170_v15 = vpop.f32.mrb[27].mxu1  ;;  %v4181_v16 = vpop.f32.mrb[23].mxu0 }
 0x356   :  { %v3736_v17 = vmul.f32 -1.442695, %v1160_v12  ;;  %v3737_v18 = vmul.f32 -1.442695, %v1233_v14 }
 0x358   :  { %4758 = vpow2.f32 %v3736_v17 }
 0x359   :  { %4760 = vpow2.f32 %v3737_v18 }
 0x35b   :  { %v1302_v19 = vpop.f32.mrb[28].mxu1  ;;  %v1375_v21 = vpop.f32.mrb[24].mxu0 }
 0x35c   :  { %v1379_v22 = vadd.f32 %v1375_v21, %v1308_v20  ;;  %v4192_v24 = vpop.f32.mrb[29].mxu1  ;;  %v4203_v25 = vpop.f32.mrb[25].mxu0  ;;  %v1306_v28 = vadd.f32 %v1302_v19, %v1235_v26  ;;  %v1804_v26 = vld [vmem:[#allocation3 + $0x18] sm:$0xff] }
 0x35d   :  { %v1728_v24 = vld [vmem:[#allocation2 + $0x18] sm:$0xff] }
 0x35e   :  { %v3738_v27 = vmul.f32 -1.442695, %v1379_v22 }
 0x360   :  { %4762 = vpow2.f32 %v3738_v27 }
 0x361   :  { %4764 = vtanh.f32 %v1306_v28 }
 0x362   :  { %v4759_v29 = vpop.eup %4758 }
 0x363   :  { %v4761_v30 = vpop.eup %4760  ;;  %v1383_v31 = vadd.f32 1.0, %v4759_v29 }
 0x364   :  { %v1389_v32 = vadd.f32 1.0, %v4761_v30 }
 0x365   :  { %4766 = vrcp.f32 %v1383_v31 }
 0x366   :  { %4768 = vrcp.f32 %v1389_v32 }
 0x36a   :  { %v4763_v33 = vpop.eup %4762 }
 0x36b   :  { %v4765_v34 = vpop.eup %4764  ;;  %v1396_v38 = vadd.f32 1.0, %v4763_v33 }
 0x36d   :  { %4770 = vrcp.f32 %v1396_v38 }
 0x36f   :  { %v4767_v35 = vpop.eup %4766 }
 0x370   :  { %v4769_v36 = vpop.eup %4768  ;;  %v1400_v37 = vmul.f32 %v4767_v35, %v4765_v34  ;;  %v1950_v35 = vld [vmem:[#allocation5 + $0x18] sm:$0xff] }
 0x371   :  { %v1399_v39 = vmul.f32 %v4769_v36, %v5285_v0  ;;  %v1556_v0 = vld [vmem:[#allocation4 + $0x10] sm:$0xff] }
 0x373   :  { %v5318_v40 = vadd.f32 %v1400_v37, %v1399_v39 }
 0x375   :  { %4772 = vtanh.f32 %v5318_v40 }
 0x377   :  { %v4771_v42 = vpop.eup %4770 }
 0x37f   :  { %v4773_v43 = vpop.eup %4772 }
 0x380   :  { %v1403_v44 = vmul.f32 %v4773_v43, %v4771_v42 }
 0x382   :  { %1405 = vst.msk [vmem:[#allocation6 + $0x8] sm:$0xff] %vm367_vm12, %v1403_v44  ;;  %4213 = vmatmul.mubr.msk.f32.vlgmr.msra.gmra.mrb[30].mxu1 %vm367_vm12, %v1403_v44  ;;  %4224 = vmatmul.mubr.msk.f32.vlgmr.msra.gmra.mrb[26].mxu0 %vm367_vm12, %v1403_v44 }
 0x383   :  { %4590 = vmatpush3.bf16.msra.mxu1 %v5192_v10  ;;  %4596 = vmatpush3.bf16.msra.mxu0 %v5162_v4 }
 0x384   :  { %4591 = vmatprep.subr.bf16.mxu1 %v4904_v41  ;;  %4597 = vmatprep.subr.bf16.mxu0 %v4904_v41 }
 0x385   :  { %4234 = vmatprep.mubr.msk.f32.mxu1 %vm4905_vm11, %v4903_v23  ;;  %4245 = vmatprep.mubr.msk.f32.mxu0 %vm4905_vm11, %v4903_v23 }
 0x387   :  { %4593 = vmatpush3.bf16.msra.mxu1 %v5207_v13  ;;  %4599 = vmatpush3.bf16.msra.mxu0 %v5183_v9 }
 0x388   :  { %4600 = vmatprep.subr.bf16.mxu1 %v4904_v41  ;;  %4606 = vmatprep.subr.bf16.mxu0 %v4904_v41 }
 0x38a   :  { %4235 = vmatmul.mubr.msk.f32.vlgmr.msra.gmra.mrb[32].mxu1 %vm367_vm12, %v1403_v44  ;;  %4246 = vmatmul.mubr.msk.f32.vlgmr.msra.gmra.mrb[28].mxu0 %vm367_vm12, %v1403_v44 }
 0x38b   :  { %4602 = vmatpush3.bf16.msra.mxu1 %v5058_v47  ;;  %4608 = vmatpush3.bf16.msra.mxu0 %v5131_v62 }
 0x38c   :  { %4603 = vmatprep.subr.bf16.mxu1 %v4904_v41  ;;  %4609 = vmatprep.subr.bf16.mxu0 %v4904_v41 }
 0x38d   :  { %4256 = vmatprep.mubr.msk.f32.mxu1 %vm4905_vm11, %v4903_v23  ;;  %4267 = vmatprep.mubr.msk.f32.mxu0 %vm4905_vm11, %v4903_v23 }
 0x38f   :  { %4605 = vmatpush3.bf16.msra.mxu1 %v5079_v53  ;;  %4611 = vmatpush3.bf16.msra.mxu0 %v5145_v1 }
 0x390   :  { %4612 = vmatprep.subr.bf16.mxu1 %v4904_v41  ;;  %4618 = vmatprep.subr.bf16.mxu0 %v4904_v41 }
 0x455   :  { %v1477_v46 = vpop.f32.mrb[30].mxu1  ;;  %v1550_v49 = vpop.f32.mrb[26].mxu0 }
 0x456   :  { %v1481_v50 = vadd.f32 %v1477_v46, %v1407_v45  ;;  %v1554_v51 = vadd.f32 %v1550_v49, %v1483_v48  ;;  %v4214_v52 = vpop.f32.mrb[31].mxu1  ;;  %v4225_v54 = vpop.f32.mrb[27].mxu0 }
 0x458   :  { %v3743_v55 = vmul.f32 -1.442695, %v1481_v50  ;;  %v3744_v56 = vmul.f32 -1.442695, %v1554_v51 }
 0x45a   :  { %4774 = vpow2.f32 %v3743_v55 }
 0x45b   :  { %4776 = vpow2.f32 %v3744_v56 }
 0x45d   :  { %v1623_v57 = vpop.f32.mrb[32].mxu1  ;;  %v1696_v59 = vpop.f32.mrb[28].mxu0 }
 0x45e   :  { %v1700_v60 = vadd.f32 %v1696_v59, %v1629_v58  ;;  %v4236_v61 = vpop.f32.mrb[33].mxu1  ;;  %v4247_v63 = vpop.f32.mrb[29].mxu0  ;;  %v1627_v3 = vadd.f32 %v1623_v57, %v1556_v0  ;;  %v2125_v0 = vld [vmem:[#allocation3 + $0x20] sm:$0xff] }
 0x45f   :  { %v2049_v61 = vld [vmem:[#allocation2 + $0x20] sm:$0xff] }
 0x460   :  { %v3745_v2 = vmul.f32 -1.442695, %v1700_v60 }
 0x462   :  { %4778 = vpow2.f32 %v3745_v2 }
 0x463   :  { %4780 = vtanh.f32 %v1627_v3 }
 0x464   :  { %v4775_v5 = vpop.eup %4774 }
 0x465   :  { %v4777_v6 = vpop.eup %4776  ;;  %v1704_v7 = vadd.f32 1.0, %v4775_v5 }
 0x466   :  { %v1710_v8 = vadd.f32 1.0, %v4777_v6 }
 0x467   :  { %4782 = vrcp.f32 %v1704_v7 }
 0x468   :  { %4784 = vrcp.f32 %v1710_v8 }
 0x46c   :  { %v4779_v11 = vpop.eup %4778 }
 0x46d   :  { %v4781_v12 = vpop.eup %4780  ;;  %v1717_v17 = vadd.f32 1.0, %v4779_v11 }
 0x46f   :  { %4786 = vrcp.f32 %v1717_v17 }
 0x471   :  { %v4783_v14 = vpop.eup %4782 }
 0x472   :  { %v4785_v15 = vpop.eup %4784  ;;  %v1721_v16 = vmul.f32 %v4783_v14, %v4781_v12  ;;  %v2271_v14 = vld [vmem:[#allocation5 + $0x20] sm:$0xff] }
 0x473   :  { %v1720_v18 = vmul.f32 %v4785_v15, %v5318_v40  ;;  %v1877_v40 = vld [vmem:[#allocation4 + $0x18] sm:$0xff] }
 0x475   :  { %v5351_v19 = vadd.f32 %v1721_v16, %v1720_v18 }
 0x477   :  { %4788 = vtanh.f32 %v5351_v19 }
 0x479   :  { %v4787_v20 = vpop.eup %4786 }
 0x481   :  { %v4789_v21 = vpop.eup %4788 }
 0x482   :  { %v1724_v22 = vmul.f32 %v4789_v21, %v4787_v20 }
 0x484   :  { %1726 = vst.msk [vmem:[#allocation6 + $0x10] sm:$0xff] %vm367_vm12, %v1724_v22  ;;  %4257 = vmatmul.mubr.msk.f32.vlgmr.msra.gmra.mrb[34].mxu1 %vm367_vm12, %v1724_v22  ;;  %4268 = vmatmul.mubr.msk.f32.vlgmr.msra.gmra.mrb[30].mxu0 %vm367_vm12, %v1724_v22 }
 0x485   :  { %4614 = vmatpush3.bf16.msra.mxu1 %v5192_v10  ;;  %4620 = vmatpush3.bf16.msra.mxu0 %v5162_v4 }
 0x486   :  { %4615 = vmatprep.subr.bf16.mxu1 %v4904_v41  ;;  %4621 = vmatprep.subr.bf16.mxu0 %v4904_v41 }
 0x487   :  { %4278 = vmatprep.mubr.msk.f32.mxu1 %vm4905_vm11, %v4903_v23  ;;  %4289 = vmatprep.mubr.msk.f32.mxu0 %vm4905_vm11, %v4903_v23 }
 0x489   :  { %4617 = vmatpush3.bf16.msra.mxu1 %v5207_v13  ;;  %4623 = vmatpush3.bf16.msra.mxu0 %v5183_v9 }
 0x48a   :  { %4624 = vmatprep.subr.bf16.mxu1 %v4904_v41  ;;  %4630 = vmatprep.subr.bf16.mxu0 %v4904_v41 }
 0x48c   :  { %4279 = vmatmul.mubr.msk.f32.vlgmr.msra.gmra.mrb[36].mxu1 %vm367_vm12, %v1724_v22  ;;  %4290 = vmatmul.mubr.msk.f32.vlgmr.msra.gmra.mrb[32].mxu0 %vm367_vm12, %v1724_v22 }
 0x48d   :  { %4626 = vmatpush3.bf16.msra.mxu1 %v5058_v47  ;;  %4632 = vmatpush3.bf16.msra.mxu0 %v5131_v62 }
 0x48e   :  { %4627 = vmatprep.subr.bf16.mxu1 %v4904_v41  ;;  %4633 = vmatprep.subr.bf16.mxu0 %v4904_v41 }
 0x48f   :  { %4300 = vmatprep.mubr.msk.f32.mxu1 %vm4905_vm11, %v4903_v23  ;;  %4311 = vmatprep.mubr.msk.f32.mxu0 %vm4905_vm11, %v4903_v23 }
 0x491   :  { %4629 = vmatpush3.bf16.msra.mxu1 %v5079_v53  ;;  %4635 = vmatpush3.bf16.msra.mxu0 %v5145_v1 }
 0x492   :  { %4636 = vmatprep.subr.bf16.mxu1 %v4904_v41  ;;  %4642 = vmatprep.subr.bf16.mxu0 %v4904_v41 }
 0x557   :  { %v1798_v25 = vpop.f32.mrb[34].mxu1  ;;  %v1871_v27 = vpop.f32.mrb[30].mxu0 }
 0x558   :  { %v1802_v28 = vadd.f32 %v1798_v25, %v1728_v24  ;;  %v1875_v29 = vadd.f32 %v1871_v27, %v1804_v26  ;;  %v4258_v30 = vpop.f32.mrb[35].mxu1  ;;  %v4269_v31 = vpop.f32.mrb[31].mxu0 }
 0x55a   :  { %v3750_v32 = vmul.f32 -1.442695, %v1802_v28  ;;  %v3751_v33 = vmul.f32 -1.442695, %v1875_v29 }
 0x55c   :  { %4790 = vpow2.f32 %v3750_v32 }
 0x55d   :  { %4792 = vpow2.f32 %v3751_v33 }
 0x55f   :  { %v1944_v34 = vpop.f32.mrb[36].mxu1  ;;  %v2017_v36 = vpop.f32.mrb[32].mxu0 }
 0x560   :  { %v2021_v37 = vadd.f32 %v2017_v36, %v1950_v35  ;;  %v4280_v38 = vpop.f32.mrb[37].mxu1  ;;  %v4291_v39 = vpop.f32.mrb[33].mxu0  ;;  %v1948_v43 = vadd.f32 %v1944_v34, %v1877_v40  ;;  %v2446_v40 = vld [vmem:[#allocation3 + $0x28] sm:$0xff] }
 0x561   :  { %v2370_v38 = vld [vmem:[#allocation2 + $0x28] sm:$0xff] }
 0x562   :  { %v3752_v42 = vmul.f32 -1.442695, %v2021_v37 }
 0x564   :  { %4794 = vpow2.f32 %v3752_v42 }
 0x565   :  { %4796 = vtanh.f32 %v1948_v43 }
 0x566   :  { %v4791_v44 = vpop.eup %4790 }
 0x567   :  { %v4793_v45 = vpop.eup %4792  ;;  %v2025_v46 = vadd.f32 1.0, %v4791_v44 }
 0x568   :  { %v2031_v48 = vadd.f32 1.0, %v4793_v45 }
 0x569   :  { %4798 = vrcp.f32 %v2025_v46 }
 0x56a   :  { %4800 = vrcp.f32 %v2031_v48 }
 0x56e   :  { %v4795_v49 = vpop.eup %4794 }
 0x56f   :  { %v4797_v50 = vpop.eup %4796  ;;  %v2038_v55 = vadd.f32 1.0, %v4795_v49 }
 0x571   :  { %4802 = vrcp.f32 %v2038_v55 }
 0x573   :  { %v4799_v51 = vpop.eup %4798 }
 0x574   :  { %v4801_v52 = vpop.eup %4800  ;;  %v2042_v54 = vmul.f32 %v4799_v51, %v4797_v50  ;;  %v2592_v51 = vld [vmem:[#allocation5 + $0x28] sm:$0xff] }
 0x575   :  { %v2041_v56 = vmul.f32 %v4801_v52, %v5351_v19  ;;  %v2198_v19 = vld [vmem:[#allocation4 + $0x20] sm:$0xff] }
 0x577   :  { %v5384_v57 = vadd.f32 %v2042_v54, %v2041_v56 }
 0x579   :  { %4804 = vtanh.f32 %v5384_v57 }
 0x57b   :  { %v4803_v58 = vpop.eup %4802 }
 0x583   :  { %v4805_v59 = vpop.eup %4804 }
 0x584   :  { %v2045_v60 = vmul.f32 %v4805_v59, %v4803_v58 }
 0x586   :  { %2047 = vst.msk [vmem:[#allocation6 + $0x18] sm:$0xff] %vm367_vm12, %v2045_v60  ;;  %4301 = vmatmul.mubr.msk.f32.vlgmr.msra.gmra.mrb[38].mxu1 %vm367_vm12, %v2045_v60  ;;  %4312 = vmatmul.mubr.msk.f32.vlgmr.msra.gmra.mrb[34].mxu0 %vm367_vm12, %v2045_v60 }
 0x587   :  { %4638 = vmatpush3.bf16.msra.mxu1 %v5192_v10  ;;  %4644 = vmatpush3.bf16.msra.mxu0 %v5162_v4 }
 0x588   :  { %4639 = vmatprep.subr.bf16.mxu1 %v4904_v41  ;;  %4645 = vmatprep.subr.bf16.mxu0 %v4904_v41 }
 0x589   :  { %4322 = vmatprep.mubr.msk.f32.mxu1 %vm4905_vm11, %v4903_v23  ;;  %4333 = vmatprep.mubr.msk.f32.mxu0 %vm4905_vm11, %v4903_v23 }
 0x58b   :  { %4641 = vmatpush3.bf16.msra.mxu1 %v5207_v13  ;;  %4647 = vmatpush3.bf16.msra.mxu0 %v5183_v9 }
 0x58c   :  { %4648 = vmatprep.subr.bf16.mxu1 %v4904_v41  ;;  %4654 = vmatprep.subr.bf16.mxu0 %v4904_v41 }
 0x58e   :  { %4323 = vmatmul.mubr.msk.f32.vlgmr.msra.gmra.mrb[40].mxu1 %vm367_vm12, %v2045_v60  ;;  %4334 = vmatmul.mubr.msk.f32.vlgmr.msra.gmra.mrb[36].mxu0 %vm367_vm12, %v2045_v60 }
 0x58f   :  { %4650 = vmatpush3.bf16.msra.mxu1 %v5058_v47  ;;  %4656 = vmatpush3.bf16.msra.mxu0 %v5131_v62 }
 0x590   :  { %4651 = vmatprep.subr.bf16.mxu1 %v4904_v41  ;;  %4657 = vmatprep.subr.bf16.mxu0 %v4904_v41 }
 0x591   :  { %4344 = vmatprep.mubr.msk.f32.mxu1 %vm4905_vm11, %v4903_v23  ;;  %4355 = vmatprep.mubr.msk.f32.mxu0 %vm4905_vm11, %v4903_v23 }
 0x593   :  { %4653 = vmatpush3.bf16.msra.mxu1 %v5079_v53  ;;  %4659 = vmatpush3.bf16.msra.mxu0 %v5145_v1 }
 0x594   :  { %4660 = vmatprep.subr.bf16.mxu1 %v4904_v41  ;;  %4666 = vmatprep.subr.bf16.mxu0 %v4904_v41 }
 0x659   :  { %v2119_v63 = vpop.f32.mrb[38].mxu1  ;;  %v2192_v2 = vpop.f32.mrb[34].mxu0 }
 0x65a   :  { %v2123_v3 = vadd.f32 %v2119_v63, %v2049_v61  ;;  %v2196_v5 = vadd.f32 %v2192_v2, %v2125_v0  ;;  %v4302_v6 = vpop.f32.mrb[39].mxu1  ;;  %v4313_v7 = vpop.f32.mrb[35].mxu0 }
 0x65c   :  { %v3757_v8 = vmul.f32 -1.442695, %v2123_v3  ;;  %v3758_v11 = vmul.f32 -1.442695, %v2196_v5 }
 0x65e   :  { %4806 = vpow2.f32 %v3757_v8 }
 0x65f   :  { %4808 = vpow2.f32 %v3758_v11 }
 0x661   :  { %v2265_v12 = vpop.f32.mrb[40].mxu1  ;;  %v2338_v15 = vpop.f32.mrb[36].mxu0 }
 0x662   :  { %v2342_v16 = vadd.f32 %v2338_v15, %v2271_v14  ;;  %v4324_v17 = vpop.f32.mrb[41].mxu1  ;;  %v4335_v18 = vpop.f32.mrb[37].mxu0  ;;  %v2269_v21 = vadd.f32 %v2265_v12, %v2198_v19 }
 0x663   :  { %v2767_v17 = vld [vmem:[#allocation3 + $0x30] sm:$0xff] }
 0x664   :  { %v3759_v20 = vmul.f32 -1.442695, %v2342_v16 }
 0x666   :  { %4810 = vpow2.f32 %v3759_v20 }
 0x667   :  { %4812 = vtanh.f32 %v2269_v21 }
 0x668   :  { %v4807_v22 = vpop.eup %4806 }
 0x669   :  { %v4809_v24 = vpop.eup %4808  ;;  %v2346_v25 = vadd.f32 1.0, %v4807_v22 }
 0x66a   :  { %v2352_v26 = vadd.f32 1.0, %v4809_v24 }
 0x66b   :  { %4814 = vrcp.f32 %v2346_v25 }
 0x66c   :  { %4816 = vrcp.f32 %v2352_v26 }
 0x670   :  { %v4811_v27 = vpop.eup %4810 }
 0x671   :  { %v4813_v28 = vpop.eup %4812  ;;  %v2359_v32 = vadd.f32 1.0, %v4811_v27 }
 0x673   :  { %4818 = vrcp.f32 %v2359_v32 }
 0x675   :  { %v4815_v29 = vpop.eup %4814 }
 0x676   :  { %v4817_v30 = vpop.eup %4816  ;;  %v2363_v31 = vmul.f32 %v4815_v29, %v4813_v28 }
 0x677   :  { %v2362_v33 = vmul.f32 %v4817_v30, %v5384_v57  ;;  %v2519_v57 = vld [vmem:[#allocation4 + $0x28] sm:$0xff]  ;;  %v2840_v30 = vld [vmem:[#allocation4 + $0x30] sm:$0xff] }
 0x679   :  { %v5417_v34 = vadd.f32 %v2363_v31, %v2362_v33 }
 0x67b   :  { %4820 = vtanh.f32 %v5417_v34 }
 0x67d   :  { %v4819_v35 = vpop.eup %4818 }
 0x685   :  { %v4821_v36 = vpop.eup %4820 }
 0x686   :  { %v2366_v37 = vmul.f32 %v4821_v36, %v4819_v35 }
 0x688   :  { %2368 = vst.msk [vmem:[#allocation6 + $0x20] sm:$0xff] %vm367_vm12, %v2366_v37  ;;  %4345 = vmatmul.mubr.msk.f32.vlgmr.msra.gmra.mrb[42].mxu1 %vm367_vm12, %v2366_v37  ;;  %4356 = vmatmul.mubr.msk.f32.vlgmr.msra.gmra.mrb[38].mxu0 %vm367_vm12, %v2366_v37 }
 0x689   :  { %4662 = vmatpush3.bf16.msra.mxu1 %v5192_v10  ;;  %4668 = vmatpush3.bf16.msra.mxu0 %v5162_v4 }
 0x68a   :  { %4663 = vmatprep.subr.bf16.mxu1 %v4904_v41  ;;  %4669 = vmatprep.subr.bf16.mxu0 %v4904_v41 }
 0x68b   :  { %4366 = vmatprep.mubr.msk.f32.mxu1 %vm4905_vm11, %v4903_v23  ;;  %4377 = vmatprep.mubr.msk.f32.mxu0 %vm4905_vm11, %v4903_v23 }
 0x68d   :  { %4665 = vmatpush3.bf16.msra.mxu1 %v5207_v13  ;;  %4671 = vmatpush3.bf16.msra.mxu0 %v5183_v9 }
 0x68e   :  { %4672 = vmatprep.subr.bf16.mxu1 %v4904_v41  ;;  %4678 = vmatprep.subr.bf16.mxu0 %v4904_v41 }
 0x690   :  { %4367 = vmatmul.mubr.msk.f32.vlgmr.msra.gmra.mrb[44].mxu1 %vm367_vm12, %v2366_v37  ;;  %4378 = vmatmul.mubr.msk.f32.vlgmr.msra.gmra.mrb[40].mxu0 %vm367_vm12, %v2366_v37 }
 0x691   :  { %4674 = vmatpush3.bf16.msra.mxu1 %v5058_v47  ;;  %4680 = vmatpush3.bf16.msra.mxu0 %v5131_v62 }
 0x692   :  { %4675 = vmatprep.subr.bf16.mxu1 %v4904_v41  ;;  %4681 = vmatprep.subr.bf16.mxu0 %v4904_v41 }
 0x693   :  { %4388 = vmatprep.mubr.msk.f32.mxu1 %vm4905_vm11, %v4903_v23  ;;  %4399 = vmatprep.mubr.msk.f32.mxu0 %vm4905_vm11, %v4903_v23 }
 0x695   :  { %4677 = vmatpush3.bf16.msra.mxu1 %v5079_v53  ;;  %4683 = vmatpush3.bf16.msra.mxu0 %v5145_v1 }
 0x696   :  { %4684 = vmatprep.subr.bf16.mxu1 %v4904_v41  ;;  %4690 = vmatprep.subr.bf16.mxu0 %v4904_v41 }
 0x75b   :  { %v2440_v39 = vpop.f32.mrb[42].mxu1  ;;  %v2513_v42 = vpop.f32.mrb[38].mxu0 }
 0x75c   :  { %v2444_v43 = vadd.f32 %v2440_v39, %v2370_v38  ;;  %v2517_v44 = vadd.f32 %v2513_v42, %v2446_v40  ;;  %v4346_v45 = vpop.f32.mrb[43].mxu1  ;;  %v4357_v46 = vpop.f32.mrb[39].mxu0 }
 0x75d   :  { %v3334_v46 = vld [vmem:[#allocation6] sm:$0xff] }
 0x75e   :  { %v3764_v48 = vmul.f32 -1.442695, %v2444_v43  ;;  %v3765_v49 = vmul.f32 -1.442695, %v2517_v44 }
 0x760   :  { %4822 = vpow2.f32 %v3764_v48 }
 0x761   :  { %4824 = vpow2.f32 %v3765_v49 }
 0x763   :  { %v2586_v50 = vpop.f32.mrb[44].mxu1  ;;  %v2659_v52 = vpop.f32.mrb[40].mxu0 }
 0x764   :  { %v2663_v54 = vadd.f32 %v2659_v52, %v2592_v51  ;;  %v4368_v55 = vpop.f32.mrb[45].mxu1  ;;  %v4379_v56 = vpop.f32.mrb[41].mxu0  ;;  %v2590_v59 = vadd.f32 %v2586_v50, %v2519_v57  ;;  %v3350_v51 = vld [vmem:[%s5606_s7] sm:$0xff]  ;;  %v3351_v52 = vld [vmem:[%s5606_s7 + $0x8] sm:$0xff]  ;;  %v3337_v57 = vld [vmem:[#allocation6 + $0x18] sm:$0xff] }
 0x765   :  { %v4720_v55 = vpack.c.bf16 %v3351_v52, %v3350_v51  ;;  %v3352_v56 = vld [vmem:[%s5606_s7 + $0x10] sm:$0xff] }
 0x766   :  { %v3766_v58 = vmul.f32 -1.442695, %v2663_v54  ;;  %v3335_v54 = vld [vmem:[#allocation6 + $0x8] sm:$0xff] }
 0x768   :  { %4826 = vpow2.f32 %v3766_v58  ;;  %v3338_v58 = vld [vmem:[#allocation6 + $0x20] sm:$0xff] }
 0x769   :  { %4828 = vtanh.f32 %v2590_v59 }
 0x76a   :  { %v4823_v60 = vpop.eup %4822 }
 0x76b   :  { %v4825_v61 = vpop.eup %4824  ;;  %v2667_v63 = vadd.f32 1.0, %v4823_v60 }
 0x76c   :  { %v2673_v0 = vadd.f32 1.0, %v4825_v61 }
 0x76d   :  { %4830 = vrcp.f32 %v2667_v63 }
 0x76e   :  { %4832 = vrcp.f32 %v2673_v0 }
 0x772   :  { %v4827_v2 = vpop.eup %4826 }
 0x773   :  { %v4829_v3 = vpop.eup %4828  ;;  %v2680_v8 = vadd.f32 1.0, %v4827_v2 }
 0x775   :  { %4834 = vrcp.f32 %v2680_v8  ;;  %v3501_v8 = vld [vmem:[%s5607_s9 + $0x18] sm:$0xff] }
 0x777   :  { %v4831_v5 = vpop.eup %4830 }
 0x778   :  { %v4833_v6 = vpop.eup %4832  ;;  %v2684_v7 = vmul.f32 %v4831_v5, %v4829_v3  ;;  %v3498_v3 = vld [vmem:[%s5607_s9] sm:$0xff]  ;;  %v3499_v5 = vld [vmem:[%s5607_s9 + $0x8] sm:$0xff] }
 0x779   :  { %v2683_v11 = vmul.f32 %v4833_v6, %v5417_v34  ;;  %v4728_v6 = vpack.c.bf16 %v3499_v5, %v3498_v3 }
 0x77b   :  { %v5450_v12 = vadd.f32 %v2684_v7, %v2683_v11  ;;  %v3500_v7 = vld [vmem:[%s5607_s9 + $0x10] sm:$0xff] }
 0x77c   :  { %v4732_v11 = vpack.c.bf16 %v3501_v8, %v3500_v7 }
 0x77d   :  { %4836 = vtanh.f32 %v5450_v12 }
 0x77f   :  { %v4835_v14 = vpop.eup %4834 }
 0x787   :  { %v4837_v15 = vpop.eup %4836 }
 0x788   :  { %v2687_v16 = vmul.f32 %v4837_v15, %v4835_v14  ;;  %v3088_v15 = vld [vmem:[#allocation3 + $0x38] sm:$0xff] }
 0x78a   :  { %2689 = vst.msk [vmem:[#allocation6 + $0x28] sm:$0xff] %vm367_vm12, %v2687_v16  ;;  %4389 = vmatmul.mubr.msk.f32.vlgmr.msra.gmra.mrb[46].mxu1 %vm367_vm12, %v2687_v16  ;;  %4400 = vmatmul.mubr.msk.f32.vlgmr.msra.gmra.mrb[42].mxu0 %vm367_vm12, %v2687_v16 }
 0x78b   :  { %4686 = vmatpush3.bf16.msra.mxu1 %v5192_v10  ;;  %4692 = vmatpush3.bf16.msra.mxu0 %v5162_v4 }
 0x78c   :  { %4687 = vmatprep.subr.bf16.mxu1 %v4904_v41  ;;  %4693 = vmatprep.subr.bf16.mxu0 %v4904_v41 }
 0x78d   :  { %4410 = vmatprep.mubr.msk.f32.mxu1 %vm4905_vm11, %v4903_v23  ;;  %4421 = vmatprep.mubr.msk.f32.mxu0 %vm4905_vm11, %v4903_v23 }
 0x78f   :  { %4689 = vmatpush3.bf16.msra.mxu1 %v5207_v13  ;;  %4695 = vmatpush3.bf16.msra.mxu0 %v5183_v9 }
 0x790   :  { %4696 = vmatprep.subr.bf16.mxu1 %v4904_v41  ;;  %4702 = vmatprep.subr.bf16.mxu0 %v4904_v41 }
 0x791   :  { %v3339_v59 = vld [vmem:[#allocation6 + $0x28] sm:$0xff] }
 0x792   :  { %4411 = vmatmul.mubr.msk.f32.vlgmr.msra.gmra.mrb[48].mxu1 %vm367_vm12, %v2687_v16  ;;  %4422 = vmatmul.mubr.msk.f32.vlgmr.msra.gmra.mrb[44].mxu0 %vm367_vm12, %v2687_v16 }
 0x793   :  { %4698 = vmatpush3.bf16.msra.mxu1 %v5058_v47  ;;  %4704 = vmatpush3.bf16.msra.mxu0 %v5131_v62  ;;  %v2691_v47 = vld [vmem:[#allocation2 + $0x30] sm:$0xff] }
 0x794   :  { %4699 = vmatprep.subr.bf16.mxu1 %v4904_v41  ;;  %4705 = vmatprep.subr.bf16.mxu0 %v4904_v41 }
 0x795   :  { %4432 = vmatprep.mubr.msk.f32.mxu1 %vm4905_vm11, %v4903_v23  ;;  %4443 = vmatprep.mubr.msk.f32.mxu0 %vm4905_vm11, %v4903_v23 }
 0x797   :  { %4701 = vmatpush3.bf16.msra.mxu1 %v5079_v53  ;;  %4707 = vmatpush3.bf16.msra.mxu0 %v5145_v1  ;;  %v2913_v53 = vld [vmem:[#allocation5 + $0x30] sm:$0xff] }
 0x798   :  { %4708 = vmatprep.subr.bf16.mxu1 %v4904_v41  ;;  %4714 = vmatprep.subr.bf16.mxu0 %v4904_v41 }
 0x85d   :  { %v2761_v62 = vpop.f32.mrb[46].mxu1  ;;  %v2834_v18 = vpop.f32.mrb[42].mxu0 }
 0x85e   :  { %v2765_v19 = vadd.f32 %v2761_v62, %v2691_v47  ;;  %v2838_v20 = vadd.f32 %v2834_v18, %v2767_v17  ;;  %v4390_v21 = vpop.f32.mrb[47].mxu1  ;;  %v4401_v22 = vpop.f32.mrb[43].mxu0 }
 0x85f   :  { %v3234_v22 = vld [vmem:[#allocation5 + $0x38] sm:$0xff] }
 0x860   :  { %v3771_v24 = vmul.f32 -1.442695, %v2765_v19  ;;  %v3772_v25 = vmul.f32 -1.442695, %v2838_v20 }
 0x862   :  { %4838 = vpow2.f32 %v3771_v24 }
 0x863   :  { %4840 = vpow2.f32 %v3772_v25 }
 0x865   :  { %v2907_v26 = vpop.f32.mrb[48].mxu1  ;;  %v2980_v27 = vpop.f32.mrb[44].mxu0 }
 0x866   :  { %v2984_v1 = vadd.f32 %v2980_v27, %v2913_v53  ;;  %v4412_v28 = vpop.f32.mrb[49].mxu1  ;;  %v4423_v29 = vpop.f32.mrb[45].mxu0  ;;  %v2911_v32 = vadd.f32 %v2907_v26, %v2840_v30  ;;  %v3161_v27 = vld [vmem:[#allocation4 + $0x38] sm:$0xff]  ;;  %v5535_v30 = vld [vmem:[%s5608_s8] ss:$0 sm:$0xff] }
 0x868   :  { %v3773_v31 = vmul.f32 -1.442695, %v2984_v1 }
 0x86a   :  { %4842 = vpow2.f32 %v3773_v31 }
 0x86b   :  { %4844 = vtanh.f32 %v2911_v32 }
 0x86c   :  { %v4839_v33 = vpop.eup %4838 }
 0x86d   :  { %v4841_v34 = vpop.eup %4840  ;;  %v2988_v35 = vadd.f32 1.0, %v4839_v33 }
 0x86e   :  { %v2994_v36 = vadd.f32 1.0, %v4841_v34 }
 0x86f   :  { %4846 = vrcp.f32 %v2988_v35 }
 0x870   :  { %4848 = vrcp.f32 %v2994_v36 }
 0x874   :  { %v4843_v37 = vpop.eup %4842 }
 0x875   :  { %v4845_v38 = vpop.eup %4844  ;;  %v3001_v43 = vadd.f32 1.0, %v4843_v37 }
 0x877   :  { %4850 = vrcp.f32 %v3001_v43 }
 0x879   :  { %v4847_v39 = vpop.eup %4846 }
 0x87a   :  { %v4849_v40 = vpop.eup %4848  ;;  %v3005_v42 = vmul.f32 %v4847_v39, %v4845_v38 }
 0x87b   :  { %v3004_v44 = vmul.f32 %v4849_v40, %v5450_v12  ;;  %v3012_v12 = vld [vmem:[#allocation2 + $0x38] sm:$0xff] }
 0x87d   :  { %v5483_v45 = vadd.f32 %v3005_v42, %v3004_v44 }
 0x87f   :  { %4852 = vtanh.f32 %v5483_v45 }
 0x880   :  { %4854 = vtanh.f32 %v3334_v46 }
 0x881   :  { %v4851_v48 = vpop.eup %4850  ;;  %4856 = vtanh.f32 %v3335_v54 }
 0x889   :  { %v4853_v49 = vpop.eup %4852 }
 0x88a   :  { %v3008_v50 = vmul.f32 %v4853_v49, %v4851_v48 }
 0x88c   :  { %3010 = vst.msk [vmem:[#allocation6 + $0x30] sm:$0xff] %vm367_vm12, %v3008_v50  ;;  %4433 = vmatmul.mubr.msk.f32.vlgmr.msra.gmra.mrb[50].mxu1 %vm367_vm12, %v3008_v50  ;;  %4444 = vmatmul.mubr.msk.f32.vlgmr.msra.gmra.mrb[46].mxu0 %vm367_vm12, %v3008_v50 }
 0x88d   :  { %4710 = vmatpush3.bf16.msra.mxu1 %v5192_v10  ;;  %4716 = vmatpush3.bf16.msra.mxu0 %v5162_v4  ;;  %v3353_v4 = vld [vmem:[%s5606_s7 + $0x18] sm:$0xff]  ;;  %v3336_v10 = vld [vmem:[#allocation6 + $0x10] sm:$0xff] }
 0x88e   :  { %4711 = vmatprep.subr.bf16.mxu1 %v4904_v41  ;;  %4717 = vmatprep.subr.bf16.mxu0 %v4904_v41  ;;  %v4724_v41 = vpack.c.bf16 %v3353_v4, %v3352_v56  ;;  %4858 = vtanh.f32 %v3336_v10 }
 0x88f   :  { %4454 = vmatprep.mubr.msk.f32.mxu1 %vm4905_vm11, %v4903_v23  ;;  %4465 = vmatprep.mubr.msk.f32.mxu0 %vm4905_vm11, %v4903_v23  ;;  %v4855_v23 = vpop.eup %4854  ;;  %4860 = vtanh.f32 %v3337_v57 }
 0x890   :  { %4862 = vtanh.f32 %v3338_v58 }
 0x891   :  { %4713 = vmatpush3.bf16.msra.mxu1 %v5207_v13  ;;  %4719 = vmatpush3.bf16.msra.mxu0 %v5183_v9  ;;  %4864 = vtanh.f32 %v3339_v59  ;;  %v4857_v9 = vpop.eup %4856 }
 0x892   :  { %4721 = vmatprep.subr.bf16.mxu1 %v4720_v55  ;;  %4729 = vmatprep.subr.bf16.mxu0 %v4728_v6 }
 0x893   :  { %v3340_v13 = vld [vmem:[#allocation6 + $0x30] sm:$0xff] }
 0x894   :  { %4455 = vmatmul.mubr.msk.f32.vlgmr.msra.gmra.mrb[52].mxu1 %vm367_vm12, %v3008_v50  ;;  %4466 = vmatmul.mubr.msk.f32.vlgmr.msra.gmra.mrb[48].mxu0 %vm367_vm12, %v3008_v50  ;;  %4866 = vtanh.f32 %v3340_v13 }
 0x895   :  { %4723 = vmatpush3.bf16.msra.mxu1 %v4720_v55  ;;  %4476 = vmatprep.mubr.msk.f32.mxu1 %vm367_vm12, %v4855_v23 }
 0x896   :  { %4725 = vmatprep.subr.bf16.mxu1 %v4724_v41  ;;  %4731 = vmatpush3.bf16.msra.mxu0 %v4728_v6 }
 0x897   :  { %4733 = vmatprep.subr.bf16.mxu0 %v4732_v11 }
 0x898   :  { %v4859_v60 = vpop.eup %4858 }
 0x899   :  { %4727 = vmatpush3.bf16.msra.mxu1 %v4724_v41  ;;  %v4861_v61 = vpop.eup %4860 }
 0x89a   :  { %v4863_v63 = vpop.eup %4862  ;;  %4735 = vmatpush3.bf16.msra.mxu0 %v4732_v11 }
 0x89b   :  { %v4865_v0 = vpop.eup %4864 }
 0x89c   :  { %4477 = vmatmul.mubr.msk.f32.vlgmr.msra.gmra.mrb[54].mxu1 %vm367_vm12, %v4857_v9 }
 0x89d   :  { %4479 = vmatprep.mubr.msk.f32.mxu1 %vm367_vm12, %v4859_v60 }
 0x89e   :  { %v4867_v2 = vpop.eup %4866 }
 0x8a0   :  { %4480 = vmatmul.mubr.msk.f32.gmra.mrb[56].mxu1 %vm367_vm12, %v4861_v61 }
 0x8a1   :  { %4482 = vmatprep.mubr.msk.f32.mxu1 %vm367_vm12, %v4863_v63  ;;  %v3790_v63 = vld [vmem:[%s5611_s10] ss:$0 sm:$0xff] }
 0x8a4   :  { %4483 = vmatmul.mubr.msk.f32.gmra.mrb[58].mxu1 %vm367_vm12, %v4865_v0 }
 0x8a5   :  { %4485 = vmatprep.mubr.msk.f32.mxu1 %vm367_vm12, %v4867_v2 }
 0x95f   :  { %v3082_v14 = vpop.f32.mrb[50].mxu1  ;;  %v3155_v16 = vpop.f32.mrb[46].mxu0 }
 0x960   :  { %v3086_v47 = vadd.f32 %v3082_v14, %v3012_v12  ;;  %v3159_v62 = vadd.f32 %v3155_v16, %v3088_v15  ;;  %v4434_v17 = vpop.f32.mrb[51].mxu1  ;;  %v4445_v18 = vpop.f32.mrb[47].mxu0 }
 0x962   :  { %v3778_v19 = vmul.f32 -1.442695, %v3086_v47  ;;  %v3779_v20 = vmul.f32 -1.442695, %v3159_v62 }
 0x964   :  { %4868 = vpow2.f32 %v3778_v19 }
 0x965   :  { %4870 = vpow2.f32 %v3779_v20 }
 0x967   :  { %v3228_v21 = vpop.f32.mrb[52].mxu1  ;;  %v3301_v24 = vpop.f32.mrb[48].mxu0 }
 0x968   :  { %v3305_v25 = vadd.f32 %v3301_v24, %v3234_v22  ;;  %v4456_v26 = vpop.f32.mrb[53].mxu1  ;;  %v4467_v53 = vpop.f32.mrb[49].mxu0  ;;  %v3232_v28 = vadd.f32 %v3228_v21, %v3161_v27 }
 0x96a   :  { %v3780_v1 = vmul.f32 -1.442695, %v3305_v25 }
 0x96c   :  { %4872 = vpow2.f32 %v3780_v1 }
 0x96d   :  { %4874 = vtanh.f32 %v3232_v28 }
 0x96e   :  { %v4869_v29 = vpop.eup %4868 }
 0x96f   :  { %v4871_v31 = vpop.eup %4870  ;;  %v3309_v32 = vadd.f32 1.0, %v4869_v29  ;;  %v4478_v33 = vpop.f32.mrb[54].mxu1 }
 0x970   :  { %v3315_v34 = vadd.f32 1.0, %v4871_v31  ;;  %v3451_v35 = vpop.f32.mrb[55].mxu1  ;;  %v3457_v36 = vadd.f32 %v4478_v33, %v5535_v30 }
 0x971   :  { %4876 = vrcp.f32 %v3309_v32  ;;  %v3452_v37 = vadd.f32 %v5535_v30, %v3451_v35 }
 0x972   :  { %4878 = vrcp.f32 %v3315_v34 }
 0x973   :  { %v4481_v38 = vpop.f32.mrb[56].mxu1  ;;  %4880 = vtanh.f32 %v3452_v37 }
 0x974   :  { %v3461_v39 = vpop.f32.mrb[57].mxu1  ;;  %4882 = vtanh.f32 %v3457_v36  ;;  %v3467_v40 = vadd.f32 %v4481_v38, %v5535_v30 }
 0x975   :  { %v3462_v42 = vadd.f32 %v5535_v30, %v3461_v39 }
 0x976   :  { %v4873_v46 = vpop.eup %4872 }
 0x977   :  { %4884 = vtanh.f32 %v3462_v42  ;;  %v4484_v43 = vpop.f32.mrb[58].mxu1  ;;  %v4875_v50 = vpop.eup %4874  ;;  %v3322_v55 = vadd.f32 1.0, %v4873_v46 }
 0x978   :  { %v3471_v44 = vpop.f32.mrb[59].mxu1  ;;  %4886 = vtanh.f32 %v3467_v40  ;;  %v3477_v48 = vadd.f32 %v4484_v43, %v5535_v30 }
 0x979   :  { %v3472_v49 = vadd.f32 %v5535_v30, %v3471_v44 }
 0x97b   :  { %v4877_v51 = vpop.eup %4876  ;;  %4888 = vtanh.f32 %v3472_v49 }
 0x97c   :  { %v4879_v52 = vpop.eup %4878  ;;  %v3326_v54 = vmul.f32 %v4877_v51, %v4875_v50  ;;  %4890 = vtanh.f32 %v3477_v48 }
 0x97d   :  { %v3325_v56 = vmul.f32 %v4879_v52, %v5483_v45  ;;  %v4881_v4 = vpop.eup %4880  ;;  %4892 = vrcp.f32 %v3322_v55 }
 0x97e   :  { %v4883_v10 = vpop.eup %4882  ;;  %4496 = vmatprep.mubr.msk.f32.mxu0 %vm367_vm12, %v4881_v4 }
 0x97f   :  { %v3327_v41 = vadd.f32 %v3326_v54, %v3325_v56  ;;  %4497 = vmatmul.mubr.msk.f32.vlgmr.msra.gmra.mrb[50].mxu0 %vm367_vm12, %v4883_v10 }
 0x981   :  { %v4885_v57 = vpop.eup %4884  ;;  %4894 = vtanh.f32 %v3327_v41  ;;  %3333 = vst.msk [vmem:[%s5609_s13] sm:$0xff] %vm367_vm12, %v3327_v41 }
 0x982   :  { %4499 = vmatprep.mubr.msk.f32.mxu0 %vm367_vm12, %v4885_v57  ;;  %v4887_v58 = vpop.eup %4886 }
 0x983   :  { %4500 = vmatmul.mubr.msk.f32.gmra.mrb[52].mxu0 %vm367_vm12, %v4887_v58 }
 0x985   :  { %v4889_v45 = vpop.eup %4888 }
 0x986   :  { %4502 = vmatprep.mubr.msk.f32.mxu0 %vm367_vm12, %v4889_v45  ;;  %v4891_v23 = vpop.eup %4890 }
 0x987   :  { %4503 = vmatmul.mubr.msk.f32.gmra.mrb[54].mxu0 %vm367_vm12, %v4891_v23  ;;  %v4893_v59 = vpop.eup %4892 }
 0x98b   :  { %v4895_v13 = vpop.eup %4894 }
 0x98c   :  { %v3329_v9 = vmul.f32 %v4895_v13, %v4893_v59 }
 0x98e   :  { %3331 = vst.msk [vmem:[#allocation6 + $0x38] sm:$0xff] %vm367_vm12, %v3329_v9  ;;  %3332 = vst.msk [vmem:[%s5610_s12] sm:$0xff] %vm367_vm12, %v3329_v9 }
 0x995   :  { %v3341_v60 = vld [vmem:[#allocation6 + $0x38] sm:$0xff] }
 0x996   :  { %4896 = vtanh.f32 %v3341_v60 }
 0x9a0   :  { %v4897_v61 = vpop.eup %4896 }
 0x9a1   :  { %4486 = vmatmul.mubr.msk.f32.gmra.mrb[60].mxu1 %vm367_vm12, %v4897_v61 }
 0xa52   :  { %v4498_v0 = vpop.f32.mrb[50].mxu0 }
 0xa53   :  { %v3605_v2 = vadd.f32 %v4498_v0, %v3790_v63  ;;  %v3599_v3 = vpop.f32.mrb[51].mxu0 }
 0xa54   :  { %v3600_v5 = vadd.f32 %v3790_v63, %v3599_v3 }
 0xa55   :  { %3640 = vst.msk [vmem:[%s5612_s11 + $0x8] sm:$0xff] %vm3638_vm13, %v3605_v2 }
 0xa56   :  { %3639 = vst.msk [vmem:[%s5612_s11] sm:$0xff] %vm3638_vm13, %v3600_v5  ;;  %v4501_v6 = vpop.f32.mrb[52].mxu0 }
 0xa57   :  { %v3615_v7 = vadd.f32 %v4501_v6, %v3790_v63  ;;  %v3609_v8 = vpop.f32.mrb[53].mxu0 }
 0xa58   :  { %v3610_v11 = vadd.f32 %v3790_v63, %v3609_v8 }
 0xa59   :  { %3642 = vst.msk [vmem:[%s5612_s11 + $0x18] sm:$0xff] %vm3638_vm13, %v3615_v7 }
 0xa5a   :  { %3641 = vst.msk [vmem:[%s5612_s11 + $0x10] sm:$0xff] %vm3638_vm13, %v3610_v11  ;;  %v4504_v12 = vpop.f32.mrb[54].mxu0 }
 0xa5b   :  { %v3625_v14 = vadd.f32 %v4504_v12, %v3790_v63  ;;  %v3619_v15 = vpop.f32.mrb[55].mxu0 }
 0xa5c   :  { %v3620_v16 = vadd.f32 %v3790_v63, %v3619_v15 }
 0xa5d   :  { %3644 = vst.msk [vmem:[%s5612_s11 + $0x28] sm:$0xff] %vm3638_vm13, %v3625_v14 }
 0xa5e   :  { %3643 = vst.msk [vmem:[%s5612_s11 + $0x20] sm:$0xff] %vm3638_vm13, %v3620_v16 }
 0xa74   :  { %v4487_v47 = vpop.f32.mrb[60].mxu1 }
 0xa75   :  { %v3487_v62 = vadd.f32 %v4487_v47, %v5535_v30  ;;  %v3481_v17 = vpop.f32.mrb[61].mxu1 }
 0xa76   :  { %v3482_v18 = vadd.f32 %v5535_v30, %v3481_v17 }
 0xa78   :  { %4898 = vtanh.f32 %v3482_v18 }
 0xa79   :  { %4900 = vtanh.f32 %v3487_v62 }
 0xa82   :  { %v4899_v19 = vpop.eup %4898 }
 0xa83   :  { %v4901_v20 = vpop.eup %4900  ;;  %4505 = vmatprep.mubr.msk.f32.mxu0 %vm367_vm12, %v4899_v19 }
 0xa84   :  { %4506 = vmatmul.mubr.msk.f32.gmra.mrb[56].mxu0 %vm367_vm12, %v4901_v20 }
 0xb57   :  { %v4507_v21 = vpop.f32.mrb[56].mxu0 }
 0xb58   :  { %v3635_v22 = vadd.f32 %v4507_v21, %v3790_v63  ;;  %v3629_v24 = vpop.f32.mrb[57].mxu0 }
 0xb59   :  { %v3630_v25 = vadd.f32 %v3790_v63, %v3629_v24 }
 0xb5a   :  { %3646 = vst.msk [vmem:[%s5612_s11 + $0x38] sm:$0xff] %vm3638_vm13, %v3635_v22 }
 0xb5b   :  { %3645 = vst.msk [vmem:[%s5612_s11 + $0x30] sm:$0xff] %vm3638_vm13, %v3630_v25 }

</bundles_post_ra>
